<compile_context>
chip_gen: v7x
topology: tpu7x:2x2x1
jax: 0.10.0
libtpu: 0.0.40
codegen_flags: <defaults>
</compile_context>

<pallas_src>
import jax
import jax.numpy as jnp
from jax import lax
from jax.experimental import pallas as pl
from jax.experimental.pallas import tpu as pltpu

LATENT_DIM = 2
HIDDEN_DIM = 64
OUTPUT_DIM = 2

CHUNK = 256            # batch lanes per inner compute step (2 full vreg lane-tiles)
PAIR = 2 * CHUNK       # unroll-by-2: two independent chunks per inner iteration
MAX_TILE_B = 2048      # batch block DMA'd per grid step


def decoder_kernel(z_ref,
                   w1_ref, b1_ref,
                   w2_ref, b2_ref,
                   w3_ref, b3_ref,
                   w4_ref, b4_ref,
                   wo_ref, bo_ref,
                   out_ref):
    # Lane-dense layout: z_ref is (LATENT_DIM, TILE_B) f32 (batch on lanes),
    # out_ref is (OUTPUT_DIM, TILE_B) f32.
    #
    # Hoist every loop-invariant load above the chunk loop (JAX does not CSE
    # these if they are re-issued per iteration).
    w1 = w1_ref[...]                         # (64, 2)
    w1c0, w1c1 = w1[:, 0:1], w1[:, 1:2]      # (64, 1) columns for the VPU FMAs
    b1 = b1_ref[...]                         # (64, 1)
    w2, b2 = w2_ref[...], b2_ref[...]
    w3, b3 = w3_ref[...], b3_ref[...]
    w4, b4 = w4_ref[...], b4_ref[...]
    wo, bo = wo_ref[...], bo_ref[...]
    # NOTE: biases stay (64, 1); broadcasting them to (64, CHUNK) once would
    # pin 5 x 16 f32 vregs and blow the 64-vreg budget, so the per-layer add
    # keeps the (cheap) lane splat.

    def hidden_pair(w, b, ha, hb):
        # Two independent (64,64)x(64,CHUNK) MXU matmuls issued back-to-back
        # so Mosaic can interleave/dual-issue them; bias + ReLU on the VPU.
        ya = jnp.dot(w, ha, preferred_element_type=jnp.float32) + b
        yb = jnp.dot(w, hb, preferred_element_type=jnp.float32) + b
        return jnp.maximum(ya, 0.0), jnp.maximum(yb, 0.0)

    def mlp_pair(za, zb):
        # fc1 (K = 2 contraction): VPU broadcast FMAs, keep it off the MXU.
        ha = jnp.maximum(w1c0 * za[0:1, :] + w1c1 * za[1:2, :] + b1, 0.0)
        hb = jnp.maximum(w1c0 * zb[0:1, :] + w1c1 * zb[1:2, :] + b1, 0.0)
        ha, hb = hidden_pair(w2, b2, ha, hb)
        ha, hb = hidden_pair(w3, b3, ha, hb)
        ha, hb = hidden_pair(w4, b4, ha, hb)
        oa = jnp.dot(wo, ha, preferred_element_type=jnp.float32) + bo
        ob = jnp.dot(wo, hb, preferred_element_type=jnp.float32) + bo
        return oa, ob

    n_pairs = out_ref.shape[1] // PAIR       # static: TILE_B is a multiple of PAIR

    def body(p, carry):
        c0 = pl.multiple_of(p * PAIR, CHUNK)
        c1 = pl.multiple_of(p * PAIR + CHUNK, CHUNK)
        oa, ob = mlp_pair(z_ref[:, pl.ds(c0, CHUNK)],
                          z_ref[:, pl.ds(c1, CHUNK)])
        out_ref[:, pl.ds(c0, CHUNK)] = oa    # lane-dense slab stores
        out_ref[:, pl.ds(c1, CHUNK)] = ob
        return carry

    lax.fori_loop(0, n_pairs, body, 0, unroll=True)


def _pick_tile_b(batch):
    """Batch block per grid step: as large as possible (amortizes per-step
    overhead, lengthens DMA segments), a multiple of PAIR for the in-kernel
    unroll-by-2 chunk loop, and capped so the grid keeps >= 2 steps when the
    batch allows it (v7x shards the 'parallel' axis across its 2 TensorCores).
    VMEM is a non-issue: the whole working set is well under 1 MiB."""
    b_align = PAIR * pl.cdiv(batch, PAIR)
    tile = min(MAX_TILE_B, b_align)
    if b_align // tile >= 2:
        return tile
    if b_align >= 2 * PAIR:
        tile = PAIR * pl.cdiv(b_align // 2, PAIR)
    return tile


@jax.jit
def decoder_forward(z, params):
    """z: (B, LATENT_DIM) f32 -> (B, OUTPUT_DIM) f32 (PyTorch Decoder.forward)."""
    batch = z.shape[0]
    tile_b = _pick_tile_b(batch)
    n_tiles = pl.cdiv(batch, tile_b)

    # Lane-dense (features, batch) layout for the kernel. No jnp.pad: Pallas
    # masks the ragged last block (garbage lanes stay in their own lanes and
    # the ragged part of the output block is dropped at writeback).
    z_t = z.T                                            # (LATENT_DIM, B)

    const = lambda i: (0, 0)                             # weights stay VMEM-resident
    batch_blk = lambda i: (0, i)                         # walk the batch (lane) axis

    in_specs = [
        pl.BlockSpec((LATENT_DIM, tile_b), batch_blk),   # z
        pl.BlockSpec((HIDDEN_DIM, LATENT_DIM), const),   # w1
        pl.BlockSpec((HIDDEN_DIM, 1), const),            # b1
        pl.BlockSpec((HIDDEN_DIM, HIDDEN_DIM), const),   # w2
        pl.BlockSpec((HIDDEN_DIM, 1), const),            # b2
        pl.BlockSpec((HIDDEN_DIM, HIDDEN_DIM), const),   # w3
        pl.BlockSpec((HIDDEN_DIM, 1), const),            # b3
        pl.BlockSpec((HIDDEN_DIM, HIDDEN_DIM), const),   # w4
        pl.BlockSpec((HIDDEN_DIM, 1), const),            # b4
        pl.BlockSpec((OUTPUT_DIM, HIDDEN_DIM), const),   # wo
        pl.BlockSpec((OUTPUT_DIM, 1), const),            # bo
    ]
    out_spec = pl.BlockSpec((OUTPUT_DIM, tile_b), batch_blk)

    out_t = pl.pallas_call(
        decoder_kernel,
        out_shape=jax.ShapeDtypeStruct((OUTPUT_DIM, batch), jnp.float32),
        grid=(n_tiles,),
        in_specs=in_specs,
        out_specs=out_spec,
        compiler_params=pltpu.CompilerParams(
            dimension_semantics=("parallel",)),
    )(z_t,
      params["w1"], params["b1"],
      params["w2"], params["b2"],
      params["w3"], params["b3"],
      params["w4"], params["b4"],
      params["wo"], params["bo"])

    # TODO(synk): keep the surrounding VAE in (features, batch) layout end-to-end
    # to drop this transpose and the z.T above; the module contract here is (B, 2).
    return out_t.T


def init_params(key):
    """PyTorch nn.Linear-style init U(-1/sqrt(fan_in), +1/sqrt(fan_in)).
    Weights kept f32 (parity with the PyTorch module) in nn.Linear's native
    (out_features, in_features) layout; biases as (out_features, 1) columns so
    they lane-broadcast against (features, batch) activations."""
    def linear(k, fan_in, fan_out):
        kw, kb = jax.random.split(k)
        bound = 1.0 / jnp.sqrt(fan_in)
        w = jax.random.uniform(kw, (fan_out, fan_in), jnp.float32, -bound, bound)
        b = jax.random.uniform(kb, (fan_out, 1), jnp.float32, -bound, bound)
        return w, b

    keys = jax.random.split(key, 5)
    w1, b1 = linear(keys[0], LATENT_DIM, HIDDEN_DIM)
    w2, b2 = linear(keys[1], HIDDEN_DIM, HIDDEN_DIM)
    w3, b3 = linear(keys[2], HIDDEN_DIM, HIDDEN_DIM)
    w4, b4 = linear(keys[3], HIDDEN_DIM, HIDDEN_DIM)
    wo, bo = linear(keys[4], HIDDEN_DIM, OUTPUT_DIM)
    return dict(w1=w1, b1=b1, w2=w2, b2=b2, w3=w3, b3=b3,
                w4=w4, b4=b4, wo=wo, bo=bo)


def reference_forward(z, p):
    """Pure-JAX f32 reference mirroring the PyTorch Decoder (highest matmul
    precision so it tracks the f32 module exactly; the kernel's MXU rounding
    mode may differ by O(1e-3), covered by the test tolerance)."""
    hp = jax.lax.Precision.HIGHEST
    h = jnp.maximum(jnp.dot(z, p["w1"].T, precision=hp) + p["b1"][:, 0], 0.0)
    for wk, bk in (("w2", "b2"), ("w3", "b3"), ("w4", "b4")):
        h = jnp.maximum(jnp.dot(h, p[wk].T, precision=hp) + p[bk][:, 0], 0.0)
    return jnp.dot(h, p["wo"].T, precision=hp) + p["bo"][:, 0]


if __name__ == "__main__":
    key = jax.random.PRNGKey(0)
    k_params, k_z = jax.random.split(key)
    params = init_params(k_params)

    # Two batch sizes: one smaller than a single block (single tile, ragged),
    # and one exercising the multi-tile grid + multi-pair inner chunk loop +
    # ragged last block.
    for batch in (300, 1500):
        z = jax.random.normal(jax.random.fold_in(k_z, batch),
                              (batch, LATENT_DIM), jnp.float32)
        out = jax.block_until_ready(decoder_forward(z, params))
        ref = reference_forward(z, params)
        assert out.shape == (batch, OUTPUT_DIM), out.shape
        assert jnp.allclose(out, ref, atol=1e-2, rtol=1e-2), \
            f"mismatch vs reference at batch={batch}"

    print("KERNEL_OK")
</pallas_src>

<mosaic_0001>
module attributes {stable_mosaic.version = 11 : i64} {
  func.func @decoder_kernel(%arg0: i32, %arg1: memref<2x512xf32, #tpu.memory_space<vmem>>, %arg2: memref<64x2xf32, #tpu.memory_space<vmem>>, %arg3: memref<64x1xf32, #tpu.memory_space<vmem>>, %arg4: memref<64x64xf32, #tpu.memory_space<vmem>>, %arg5: memref<64x1xf32, #tpu.memory_space<vmem>>, %arg6: memref<64x64xf32, #tpu.memory_space<vmem>>, %arg7: memref<64x1xf32, #tpu.memory_space<vmem>>, %arg8: memref<64x64xf32, #tpu.memory_space<vmem>>, %arg9: memref<64x1xf32, #tpu.memory_space<vmem>>, %arg10: memref<2x64xf32, #tpu.memory_space<vmem>>, %arg11: memref<2x1xf32, #tpu.memory_space<vmem>>, %arg12: memref<2x512xf32, #tpu.memory_space<vmem>>) attributes {dimension_semantics = [#tpu.dimension_semantics<parallel>], iteration_bounds = array<i64: 1>, scalar_prefetch = 0 : i64, scratch_operands = 0 : i64, tpu.core_type = #tpu.core_type<tc>, window_params = [{transform_indices = @transform_0, window_bounds = array<i64: 2, 512>}, {pipeline_mode = #tpu.pipeline_mode<synchronous>, transform_indices = @transform_1, window_bounds = array<i64: 64, 2>}, {pipeline_mode = #tpu.pipeline_mode<synchronous>, transform_indices = @transform_2, window_bounds = array<i64: 64, 1>}, {pipeline_mode = #tpu.pipeline_mode<synchronous>, transform_indices = @transform_3, window_bounds = array<i64: 64, 64>}, {pipeline_mode = #tpu.pipeline_mode<synchronous>, transform_indices = @transform_4, window_bounds = array<i64: 64, 1>}, {pipeline_mode = #tpu.pipeline_mode<synchronous>, transform_indices = @transform_5, window_bounds = array<i64: 64, 64>}, {pipeline_mode = #tpu.pipeline_mode<synchronous>, transform_indices = @transform_6, window_bounds = array<i64: 64, 1>}, {pipeline_mode = #tpu.pipeline_mode<synchronous>, transform_indices = @transform_7, window_bounds = array<i64: 64, 64>}, {pipeline_mode = #tpu.pipeline_mode<synchronous>, transform_indices = @transform_8, window_bounds = array<i64: 64, 1>}, {pipeline_mode = #tpu.pipeline_mode<synchronous>, transform_indices = @transform_9, window_bounds = array<i64: 2, 64>}, {pipeline_mode = #tpu.pipeline_mode<synchronous>, transform_indices = @transform_10, window_bounds = array<i64: 2, 1>}, {transform_indices = @transform_11, window_bounds = array<i64: 2, 512>}]} {
    %c0 = arith.constant 0 : index
    %c0_0 = arith.constant 0 : index
    %0 = vector.load %arg2[%c0, %c0_0] : memref<64x2xf32, #tpu.memory_space<vmem>>, vector<64x2xf32>
    %1 = vector.extract_strided_slice %0 {offsets = [0, 0], sizes = [64, 1], strides = [1, 1]} : vector<64x2xf32> to vector<64x1xf32>
    %2 = vector.extract_strided_slice %0 {offsets = [0, 1], sizes = [64, 1], strides = [1, 1]} : vector<64x2xf32> to vector<64x1xf32>
    %c0_1 = arith.constant 0 : index
    %c0_2 = arith.constant 0 : index
    %3 = vector.load %arg3[%c0_1, %c0_2] : memref<64x1xf32, #tpu.memory_space<vmem>>, vector<64x1xf32>
    %c0_3 = arith.constant 0 : index
    %c0_4 = arith.constant 0 : index
    %4 = vector.load %arg4[%c0_3, %c0_4] : memref<64x64xf32, #tpu.memory_space<vmem>>, vector<64x64xf32>
    %c0_5 = arith.constant 0 : index
    %c0_6 = arith.constant 0 : index
    %5 = vector.load %arg5[%c0_5, %c0_6] : memref<64x1xf32, #tpu.memory_space<vmem>>, vector<64x1xf32>
    %c0_7 = arith.constant 0 : index
    %c0_8 = arith.constant 0 : index
    %6 = vector.load %arg6[%c0_7, %c0_8] : memref<64x64xf32, #tpu.memory_space<vmem>>, vector<64x64xf32>
    %c0_9 = arith.constant 0 : index
    %c0_10 = arith.constant 0 : index
    %7 = vector.load %arg7[%c0_9, %c0_10] : memref<64x1xf32, #tpu.memory_space<vmem>>, vector<64x1xf32>
    %c0_11 = arith.constant 0 : index
    %c0_12 = arith.constant 0 : index
    %8 = vector.load %arg8[%c0_11, %c0_12] : memref<64x64xf32, #tpu.memory_space<vmem>>, vector<64x64xf32>
    %c0_13 = arith.constant 0 : index
    %c0_14 = arith.constant 0 : index
    %9 = vector.load %arg9[%c0_13, %c0_14] : memref<64x1xf32, #tpu.memory_space<vmem>>, vector<64x1xf32>
    %c0_15 = arith.constant 0 : index
    %c0_16 = arith.constant 0 : index
    %10 = vector.load %arg10[%c0_15, %c0_16] : memref<2x64xf32, #tpu.memory_space<vmem>>, vector<2x64xf32>
    %c0_17 = arith.constant 0 : index
    %c0_18 = arith.constant 0 : index
    %11 = vector.load %arg11[%c0_17, %c0_18] : memref<2x1xf32, #tpu.memory_space<vmem>>, vector<2x1xf32>
    %c0_i32 = arith.constant 0 : i32
    %c512_i32 = arith.constant 512 : i32
    %12 = arith.muli %c0_i32, %c512_i32 : i32
    %13 = tpu.assume_multiple %12, 256 : i32
    %c512_i32_19 = arith.constant 512 : i32
    %14 = arith.muli %c0_i32, %c512_i32_19 : i32
    %c256_i32 = arith.constant 256 : i32
    %15 = arith.addi %14, %c256_i32 : i32
    %16 = tpu.assume_multiple %15, 256 : i32
    %c0_20 = arith.constant 0 : index
    %17 = arith.index_cast %13 : i32 to index
    %18 = vector.load %arg1[%c0_20, %17] : memref<2x512xf32, #tpu.memory_space<vmem>>, vector<2x256xf32>
    %c0_21 = arith.constant 0 : index
    %19 = arith.index_cast %16 : i32 to index
    %20 = vector.load %arg1[%c0_21, %19] : memref<2x512xf32, #tpu.memory_space<vmem>>, vector<2x256xf32>
    %21 = vector.extract_strided_slice %18 {offsets = [0, 0], sizes = [1, 256], strides = [1, 1]} : vector<2x256xf32> to vector<1x256xf32>
    %22 = vector.broadcast %1 : vector<64x1xf32> to vector<64x256xf32>
    %23 = vector.broadcast %21 : vector<1x256xf32> to vector<64x256xf32>
    %24 = arith.mulf %22, %23 : vector<64x256xf32>
    %25 = vector.extract_strided_slice %18 {offsets = [1, 0], sizes = [1, 256], strides = [1, 1]} : vector<2x256xf32> to vector<1x256xf32>
    %26 = vector.broadcast %2 : vector<64x1xf32> to vector<64x256xf32>
    %27 = vector.broadcast %25 : vector<1x256xf32> to vector<64x256xf32>
    %28 = arith.mulf %26, %27 : vector<64x256xf32>
    %29 = arith.addf %24, %28 : vector<64x256xf32>
    %30 = vector.broadcast %3 : vector<64x1xf32> to vector<64x256xf32>
    %31 = arith.addf %29, %30 : vector<64x256xf32>
    %cst = arith.constant 0.000000e+00 : f32
    %32 = vector.broadcast %cst : f32 to vector<64x256xf32>
    %33 = arith.maximumf %31, %32 : vector<64x256xf32>
    %34 = vector.extract_strided_slice %20 {offsets = [0, 0], sizes = [1, 256], strides = [1, 1]} : vector<2x256xf32> to vector<1x256xf32>
    %35 = vector.broadcast %1 : vector<64x1xf32> to vector<64x256xf32>
    %36 = vector.broadcast %34 : vector<1x256xf32> to vector<64x256xf32>
    %37 = arith.mulf %35, %36 : vector<64x256xf32>
    %38 = vector.extract_strided_slice %20 {offsets = [1, 0], sizes = [1, 256], strides = [1, 1]} : vector<2x256xf32> to vector<1x256xf32>
    %39 = vector.broadcast %2 : vector<64x1xf32> to vector<64x256xf32>
    %40 = vector.broadcast %38 : vector<1x256xf32> to vector<64x256xf32>
    %41 = arith.mulf %39, %40 : vector<64x256xf32>
    %42 = arith.addf %37, %41 : vector<64x256xf32>
    %43 = vector.broadcast %3 : vector<64x1xf32> to vector<64x256xf32>
    %44 = arith.addf %42, %43 : vector<64x256xf32>
    %cst_22 = arith.constant 0.000000e+00 : f32
    %45 = vector.broadcast %cst_22 : f32 to vector<64x256xf32>
    %46 = arith.maximumf %44, %45 : vector<64x256xf32>
    %cst_23 = arith.constant dense<0.000000e+00> : vector<64x256xf32>
    %47 = tpu.matmul %4, %33, %cst_23 {dimension_numbers = #tpu.dot_dimension_numbers<[1], [0], [0], [1], [0, 0, 1, 1], [], []>} : vector<64x64xf32>, vector<64x256xf32>, vector<64x256xf32> -> vector<64x256xf32>
    %48 = vector.broadcast %5 : vector<64x1xf32> to vector<64x256xf32>
    %49 = arith.addf %47, %48 : vector<64x256xf32>
    %cst_24 = arith.constant dense<0.000000e+00> : vector<64x256xf32>
    %50 = tpu.matmul %4, %46, %cst_24 {dimension_numbers = #tpu.dot_dimension_numbers<[1], [0], [0], [1], [0, 0, 1, 1], [], []>} : vector<64x64xf32>, vector<64x256xf32>, vector<64x256xf32> -> vector<64x256xf32>
    %51 = vector.broadcast %5 : vector<64x1xf32> to vector<64x256xf32>
    %52 = arith.addf %50, %51 : vector<64x256xf32>
    %cst_25 = arith.constant 0.000000e+00 : f32
    %53 = vector.broadcast %cst_25 : f32 to vector<64x256xf32>
    %54 = arith.maximumf %49, %53 : vector<64x256xf32>
    %cst_26 = arith.constant 0.000000e+00 : f32
    %55 = vector.broadcast %cst_26 : f32 to vector<64x256xf32>
    %56 = arith.maximumf %52, %55 : vector<64x256xf32>
    %cst_27 = arith.constant dense<0.000000e+00> : vector<64x256xf32>
    %57 = tpu.matmul %6, %54, %cst_27 {dimension_numbers = #tpu.dot_dimension_numbers<[1], [0], [0], [1], [0, 0, 1, 1], [], []>} : vector<64x64xf32>, vector<64x256xf32>, vector<64x256xf32> -> vector<64x256xf32>
    %58 = vector.broadcast %7 : vector<64x1xf32> to vector<64x256xf32>
    %59 = arith.addf %57, %58 : vector<64x256xf32>
    %cst_28 = arith.constant dense<0.000000e+00> : vector<64x256xf32>
    %60 = tpu.matmul %6, %56, %cst_28 {dimension_numbers = #tpu.dot_dimension_numbers<[1], [0], [0], [1], [0, 0, 1, 1], [], []>} : vector<64x64xf32>, vector<64x256xf32>, vector<64x256xf32> -> vector<64x256xf32>
    %61 = vector.broadcast %7 : vector<64x1xf32> to vector<64x256xf32>
    %62 = arith.addf %60, %61 : vector<64x256xf32>
    %cst_29 = arith.constant 0.000000e+00 : f32
    %63 = vector.broadcast %cst_29 : f32 to vector<64x256xf32>
    %64 = arith.maximumf %59, %63 : vector<64x256xf32>
    %cst_30 = arith.constant 0.000000e+00 : f32
    %65 = vector.broadcast %cst_30 : f32 to vector<64x256xf32>
    %66 = arith.maximumf %62, %65 : vector<64x256xf32>
    %cst_31 = arith.constant dense<0.000000e+00> : vector<64x256xf32>
    %67 = tpu.matmul %8, %64, %cst_31 {dimension_numbers = #tpu.dot_dimension_numbers<[1], [0], [0], [1], [0, 0, 1, 1], [], []>} : vector<64x64xf32>, vector<64x256xf32>, vector<64x256xf32> -> vector<64x256xf32>
    %68 = vector.broadcast %9 : vector<64x1xf32> to vector<64x256xf32>
    %69 = arith.addf %67, %68 : vector<64x256xf32>
    %cst_32 = arith.constant dense<0.000000e+00> : vector<64x256xf32>
    %70 = tpu.matmul %8, %66, %cst_32 {dimension_numbers = #tpu.dot_dimension_numbers<[1], [0], [0], [1], [0, 0, 1, 1], [], []>} : vector<64x64xf32>, vector<64x256xf32>, vector<64x256xf32> -> vector<64x256xf32>
    %71 = vector.broadcast %9 : vector<64x1xf32> to vector<64x256xf32>
    %72 = arith.addf %70, %71 : vector<64x256xf32>
    %cst_33 = arith.constant 0.000000e+00 : f32
    %73 = vector.broadcast %cst_33 : f32 to vector<64x256xf32>
    %74 = arith.maximumf %69, %73 : vector<64x256xf32>
    %cst_34 = arith.constant 0.000000e+00 : f32
    %75 = vector.broadcast %cst_34 : f32 to vector<64x256xf32>
    %76 = arith.maximumf %72, %75 : vector<64x256xf32>
    %cst_35 = arith.constant dense<0.000000e+00> : vector<2x256xf32>
    %77 = tpu.matmul %10, %74, %cst_35 {dimension_numbers = #tpu.dot_dimension_numbers<[1], [0], [0], [1], [0, 0, 1, 1], [], []>} : vector<2x64xf32>, vector<64x256xf32>, vector<2x256xf32> -> vector<2x256xf32>
    %78 = vector.broadcast %11 : vector<2x1xf32> to vector<2x256xf32>
    %79 = arith.addf %77, %78 : vector<2x256xf32>
    %cst_36 = arith.constant dense<0.000000e+00> : vector<2x256xf32>
    %80 = tpu.matmul %10, %76, %cst_36 {dimension_numbers = #tpu.dot_dimension_numbers<[1], [0], [0], [1], [0, 0, 1, 1], [], []>} : vector<2x64xf32>, vector<64x256xf32>, vector<2x256xf32> -> vector<2x256xf32>
    %81 = vector.broadcast %11 : vector<2x1xf32> to vector<2x256xf32>
    %82 = arith.addf %80, %81 : vector<2x256xf32>
    %c0_37 = arith.constant 0 : index
    %83 = arith.index_cast %13 : i32 to index
    %84 = vector.load %arg12[%c0_37, %83] : memref<2x512xf32, #tpu.memory_space<vmem>>, vector<2x256xf32>
    tpu.vector_store %arg12[%c0_37, %83], %79 {strides = array<i32>} : memref<2x512xf32, #tpu.memory_space<vmem>>, vector<2x256xf32>,
    %c0_38 = arith.constant 0 : index
    %85 = arith.index_cast %16 : i32 to index
    %86 = vector.load %arg12[%c0_38, %85] : memref<2x512xf32, #tpu.memory_space<vmem>>, vector<2x256xf32>
    tpu.vector_store %arg12[%c0_38, %85], %82 {strides = array<i32>} : memref<2x512xf32, #tpu.memory_space<vmem>>, vector<2x256xf32>,
    %c1_i32 = arith.constant 1 : i32
    return
  }
  func.func @transform_0(%arg0: i32) -> (i32, i32) {
    %c0_i32 = arith.constant 0 : i32
    %c0_i32_0 = arith.constant 0 : i32
    return %c0_i32, %arg0 : i32, i32
  }
  func.func @transform_1(%arg0: i32) -> (i32, i32) {
    %c0_i32 = arith.constant 0 : i32
    %c0_i32_0 = arith.constant 0 : i32
    %c0_i32_1 = arith.constant 0 : i32
    return %c0_i32, %c0_i32_0 : i32, i32
  }
  func.func @transform_2(%arg0: i32) -> (i32, i32) {
    %c0_i32 = arith.constant 0 : i32
    %c0_i32_0 = arith.constant 0 : i32
    %c0_i32_1 = arith.constant 0 : i32
    return %c0_i32, %c0_i32_0 : i32, i32
  }
  func.func @transform_3(%arg0: i32) -> (i32, i32) {
    %c0_i32 = arith.constant 0 : i32
    %c0_i32_0 = arith.constant 0 : i32
    %c0_i32_1 = arith.constant 0 : i32
    return %c0_i32, %c0_i32_0 : i32, i32
  }
  func.func @transform_4(%arg0: i32) -> (i32, i32) {
    %c0_i32 = arith.constant 0 : i32
    %c0_i32_0 = arith.constant 0 : i32
    %c0_i32_1 = arith.constant 0 : i32
    return %c0_i32, %c0_i32_0 : i32, i32
  }
  func.func @transform_5(%arg0: i32) -> (i32, i32) {
    %c0_i32 = arith.constant 0 : i32
    %c0_i32_0 = arith.constant 0 : i32
    %c0_i32_1 = arith.constant 0 : i32
    return %c0_i32, %c0_i32_0 : i32, i32
  }
  func.func @transform_6(%arg0: i32) -> (i32, i32) {
    %c0_i32 = arith.constant 0 : i32
    %c0_i32_0 = arith.constant 0 : i32
    %c0_i32_1 = arith.constant 0 : i32
    return %c0_i32, %c0_i32_0 : i32, i32
  }
  func.func @transform_7(%arg0: i32) -> (i32, i32) {
    %c0_i32 = arith.constant 0 : i32
    %c0_i32_0 = arith.constant 0 : i32
    %c0_i32_1 = arith.constant 0 : i32
    return %c0_i32, %c0_i32_0 : i32, i32
  }
  func.func @transform_8(%arg0: i32) -> (i32, i32) {
    %c0_i32 = arith.constant 0 : i32
    %c0_i32_0 = arith.constant 0 : i32
    %c0_i32_1 = arith.constant 0 : i32
    return %c0_i32, %c0_i32_0 : i32, i32
  }
  func.func @transform_9(%arg0: i32) -> (i32, i32) {
    %c0_i32 = arith.constant 0 : i32
    %c0_i32_0 = arith.constant 0 : i32
    %c0_i32_1 = arith.constant 0 : i32
    return %c0_i32, %c0_i32_0 : i32, i32
  }
  func.func @transform_10(%arg0: i32) -> (i32, i32) {
    %c0_i32 = arith.constant 0 : i32
    %c0_i32_0 = arith.constant 0 : i32
    %c0_i32_1 = arith.constant 0 : i32
    return %c0_i32, %c0_i32_0 : i32, i32
  }
  func.func @transform_11(%arg0: i32) -> (i32, i32) {
    %c0_i32 = arith.constant 0 : i32
    %c0_i32_0 = arith.constant 0 : i32
    return %c0_i32, %arg0 : i32, i32
  }
}

</mosaic_0001>

<bundles_post_ra>
// kernel: decoder_forward.1
= control target key start
LH: loop header
LB: loop body
LE: loop exit
PB: predicated region body
PF: predicated region fallthrough
CT: control target
= control target key end

     0   :  { %v1829_v2 = vmov 1   ;;  %v1830_v7 = vmov 0   ;;  %s2331_s0 = inlined_call_operand.vmem [shape: f32[2,300], index: 0, kind: input, shape index: {}]   ;;  %s2332_s1 = inlined_call_operand.vmem [shape: f32[64,2], index: 1, kind: input, shape index: {}]   ;;  %s2333_s2 = inlined_call_operand.vmem [shape: f32[64,1], index: 2, kind: input, shape index: {}]   ;;  %s2334_s3 = inlined_call_operand.vmem [shape: f32[64,64], index: 3, kind: input, shape index: {}]   ;;  %s2335_s4 = inlined_call_operand.vmem [shape: f32[64,1], index: 4, kind: input, shape index: {}]   ;;  %s2336_s5 = inlined_call_operand.vmem [shape: f32[64,64], index: 5, kind: input, shape index: {}]   ;;  %s2337_s6 = inlined_call_operand.vmem [shape: f32[64,1], index: 6, kind: input, shape index: {}]   ;;  %s2338_s7 = inlined_call_operand.vmem [shape: f32[64,64], index: 7, kind: input, shape index: {}]   ;;  %s2339_s8 = inlined_call_operand.vmem [shape: f32[64,1], index: 8, kind: input, shape index: {}]   ;;  %s2340_s9 = inlined_call_operand.vmem [shape: f32[2,64], index: 9, kind: input, shape index: {}]   ;;  %s2341_s10 = inlined_call_operand.vmem [shape: f32[2,1], index: 10, kind: input, shape index: {}]   ;;  %s2342_s11 = inlined_call_operand.hbm [shape: f32[2,300], index: 11, kind: output, shape index: {}]  }
   0x1   :  { %v41_v0 = vld [vmem:[%s2332_s1 + $0x10] sm:$0xff]  ;;  %v39_v1 = vld [vmem:[%s2332_s1] sm:$0xff]  ;;  %1797 = vset.pattern.permute.xlu0 %v1829_v2  ;;  %1795 = vset.pattern.permute.xlu1 %v1829_v2  ;;  %v40_v4 = vld [vmem:[%s2332_s1 + $0x8] sm:$0xff] }
   0x2   :  { %192 = vperm.xlu0 %1797, %v41_v0   ;;  %184 = vperm.xlu1 %1795, %v39_v1   ;;  %v43_v3 = vld [vmem:[%s2332_s1 + $0x20] sm:$0xff]  ;;  %v45_v5 = vld [vmem:[%s2332_s1 + $0x30] sm:$0xff]  ;;  %v42_v6 = vld [vmem:[%s2332_s1 + $0x18] sm:$0xff] }
   0x6   :  { %200 = vperm.xlu0 %1797, %v43_v3   ;;  %188 = vperm.xlu1 %1795, %v40_v4  }
   0xa   :  { %208 = vperm.xlu0 %1797, %v45_v5   ;;  %1796 = vset.pattern.permute.xlu1 %v1830_v7 }
   0xb   :  { %125 = vperm.xlu1 %1796, %v42_v6  }
   0xe   :  { %1802 = vset.pattern.permute.xlu0 %v1830_v7 }
   0xf   :  { %16 = vsyncpa [#allocation3], 0  ;;  %110 = vperm.xlu0 %1802, %v39_v1   ;;  %1798 = vset.pattern.permute.xlu1 %v1829_v2  ;;  %v47_v8 = vld [vmem:[%s2333_s2] sm:$0xff]  ;;  %v48_v9 = vld [vmem:[%s2333_s2 + $0x8] sm:$0xff]  ;;  %v1831_v31 = vmov 0.0   ;;  %v149_v44 = vlaneseq  ;;  %vm494_vm0 = vcmask 523264  }
  0x10   :  { %196 = vperm.xlu1 %1798, %v42_v6   ;;  %v44_v10 = vld [vmem:[%s2332_s1 + $0x28] sm:$0xff]  ;;  %v50_v11 = vld [vmem:[%s2333_s2 + $0x18] sm:$0xff]  ;;  %v63_v13 = vld [vmem:[%s2335_s4] sm:$0xff]  ;;  %583 = vmatprep.mubr.f32.mxu0 %v1831_v31 }
  0x11   :  { %v52_v12 = vld [vmem:[%s2333_s2 + $0x28] sm:$0xff]  ;;  %v49_v14 = vld [vmem:[%s2333_s2 + $0x10] sm:$0xff]  ;;  %v67_v16 = vld [vmem:[%s2335_s4 + $0x20] sm:$0xff]  ;;  %696 = vmatprep.mubr.f32.mxu1 %v1831_v31  ;;  %v150_v47 = vshrl.u32 %v149_v44, 7 }
  0x12   :  { %v65_v15 = vld [vmem:[%s2335_s4 + $0x10] sm:$0xff]  ;;  %v46_v17 = vld [vmem:[%s2332_s1 + $0x38] sm:$0xff]  ;;  %v79_v19 = vld [vmem:[%s2337_s6] sm:$0xff] }
  0x13   :  { %115 = vperm.xlu0 %1802, %v40_v4   ;;  %v69_v18 = vld [vmem:[%s2335_s4 + $0x30] sm:$0xff]  ;;  %v51_v20 = vld [vmem:[%s2333_s2 + $0x20] sm:$0xff]  ;;  %v54_v24 = vld [vmem:[%s2333_s2 + $0x38] sm:$0xff]  ;;  %v221_v50 = vsub.s32 3, %v150_v47  ;;  %v155_v51 = vsub.s32 2, %v150_v47  ;;  %v217_v54 = vsub.s32 1, %v150_v47 }
  0x14   :  { %1799 = vset.pattern.permute.xlu1 %v1830_v7  ;;  %v81_v21 = vld [vmem:[%s2337_s6 + $0x10] sm:$0xff]  ;;  %v83_v23 = vld [vmem:[%s2337_s6 + $0x20] sm:$0xff]  ;;  %v64_v26 = vld [vmem:[%s2335_s4 + $0x8] sm:$0xff]  ;;  %v151_v56 = vsub.s32 0, %v150_v47 }
  0x15   :  { %267 = vperm.xlu1 %1799, %v47_v8   ;;  %v53_v22 = vld [vmem:[%s2333_s2 + $0x30] sm:$0xff]  ;;  %v95_v27 = vld [vmem:[%s2339_s8] sm:$0xff]  ;;  %v66_v28 = vld [vmem:[%s2335_s4 + $0x18] sm:$0xff] }
  0x16   :  { %v85_v25 = vld [vmem:[%s2337_s6 + $0x30] sm:$0xff]  ;;  %v68_v30 = vld [vmem:[%s2335_s4 + $0x28] sm:$0xff]  ;;  %v99_v32 = vld [vmem:[%s2339_s8 + $0x20] sm:$0xff] }
  0x17   :  { %120 = vperm.xlu0 %1802, %v41_v0   ;;  %v97_v29 = vld [vmem:[%s2339_s8 + $0x10] sm:$0xff]  ;;  %v70_v33 = vld [vmem:[%s2335_s4 + $0x38] sm:$0xff]  ;;  %v80_v35 = vld [vmem:[%s2337_s6 + $0x8] sm:$0xff] }
  0x18   :  { %v101_v34 = vld [vmem:[%s2339_s8 + $0x30] sm:$0xff]  ;;  %v104_v36 = vld [vmem:[%s2341_s10] sm:$0x3]  ;;  %v82_v37 = vld [vmem:[%s2337_s6 + $0x18] sm:$0xff] }
  0x19   :  { %130 = vperm.xlu1 %1799, %v43_v3   ;;  %v84_v38 = vld [vmem:[%s2337_s6 + $0x28] sm:$0xff]  ;;  %v86_v39 = vld [vmem:[%s2337_s6 + $0x38] sm:$0xff]  ;;  %v105_v52 = vld [vmem:[%s2331_s0] sm:$0xf] }
  0x1a   :  { %v96_v40 = vld [vmem:[%s2339_s8 + $0x8] sm:$0xff]  ;;  %v98_v41 = vld [vmem:[%s2339_s8 + $0x18] sm:$0xff]  ;;  %v1610_v53 = vld [vmem:[%s2331_s0 + $0x4] sm:$0xf]  ;;  %v222_v58 = vrot.slane %v105_v52, %v221_v50  ;;  %v156_v60 = vrot.slane %v105_v52, %v155_v51  ;;  %v218_v62 = vrot.slane %v105_v52, %v217_v54  ;;  %v152_v0 = vrot.slane %v105_v52, %v151_v56 }
  0x1b   :  { %272 = vperm.xlu0 %1802, %v48_v9   ;;  %v100_v42 = vld [vmem:[%s2339_s8 + $0x28] sm:$0xff]  ;;  %v102_v43 = vld [vmem:[%s2339_s8 + $0x38] sm:$0xff]  ;;  %v379_v59 = vrot.slane %v1610_v53, %v221_v50  ;;  %v345_v61 = vrot.slane %v1610_v53, %v155_v51  ;;  %v375_v63 = vrot.slane %v1610_v53, %v217_v54  ;;  %v341_v1 = vrot.slane %v1610_v53, %v151_v56 }
  0x1c   :  { %v2034_v4 = vrot.slane %v222_v58, %v217_v54  ;;  %v2038_v6 = vrot.slane %v156_v60, %v151_v56  ;;  %v2042_v8 = vrot.slane %v218_v62, %v217_v54 }
  0x1d   :  { %135 = vperm.xlu1 %1799, %v44_v10   ;;  %v2044_v9 = vrot.slane %v375_v63, %v217_v54 }
  0x1f   :  { %282 = vperm.xlu0 %1802, %v50_v11   ;;  %v2048_v11 = vrot.slane %v341_v1, %v151_v56 }
  0x21   :  { %1800 = vset.pattern.permute.xlu1 %v1829_v2 }
  0x22   :  { %204 = vperm.xlu1 %1800, %v44_v10   ;;  %v2046_v10 = vrot.slane %v152_v0, %v151_v56 }
  0x23   :  { %292 = vperm.xlu0 %1802, %v52_v12  }
  0x26   :  { %1801 = vset.pattern.permute.xlu1 %v1830_v7 }
  0x27   :  { %456 = vperm.xlu0 %1802, %v63_v13   ;;  %277 = vperm.xlu1 %1801, %v49_v14  }
  0x2b   :  { %466 = vperm.xlu0 %1802, %v65_v15   ;;  %140 = vperm.xlu1 %1801, %v45_v5   ;;  %v2036_v5 = vrot.slane %v379_v59, %v217_v54 }
  0x2f   :  { %476 = vperm.xlu0 %1802, %v67_v16   ;;  %145 = vperm.xlu1 %1801, %v46_v17  }
  0x33   :  { %486 = vperm.xlu0 %1802, %v69_v18   ;;  %1803 = vset.pattern.permute.xlu1 %v1829_v2 }
  0x34   :  { %212 = vperm.xlu1 %1803, %v46_v17  }
  0x37   :  { %779 = vperm.xlu0 %1802, %v79_v19  }
  0x38   :  { %1804 = vset.pattern.permute.xlu1 %v1830_v7  ;;  %v2040_v7 = vrot.slane %v345_v61, %v151_v56 }
  0x39   :  { %287 = vperm.xlu1 %1804, %v51_v20  }
  0x3b   :  { %789 = vperm.xlu0 %1802, %v81_v21  }
  0x3d   :  { %297 = vperm.xlu1 %1804, %v53_v22  }
  0x3f   :  { %799 = vperm.xlu0 %1802, %v83_v23  }
  0x41   :  { %302 = vperm.xlu1 %1804, %v54_v24  }
  0x43   :  { %809 = vperm.xlu0 %1802, %v85_v25  }
  0x45   :  { %461 = vperm.xlu1 %1804, %v64_v26  }
  0x47   :  { %1101 = vperm.xlu0 %1802, %v95_v27  }
  0x49   :  { %471 = vperm.xlu1 %1804, %v66_v28  }
  0x4b   :  { %1111 = vperm.xlu0 %1802, %v97_v29  }
  0x4d   :  { %481 = vperm.xlu1 %1804, %v68_v30  }
  0x4f   :  { %1121 = vperm.xlu0 %1802, %v99_v32  }
  0x51   :  { %491 = vperm.xlu1 %1804, %v70_v33  }
  0x53   :  { %1131 = vperm.xlu0 %1802, %v101_v34  }
  0x55   :  { %784 = vperm.xlu1 %1804, %v80_v35  }
  0x57   :  { %1423 = vperm.xlu0 %1802, %v104_v36  }
  0x59   :  { %794 = vperm.xlu1 %1804, %v82_v37  }
  0x5d   :  { %804 = vperm.xlu1 %1804, %v84_v38  }
  0x61   :  { %814 = vperm.xlu1 %1804, %v86_v39  }
  0x65   :  { %1106 = vperm.xlu1 %1804, %v96_v40  }
  0x69   :  { %1116 = vperm.xlu1 %1804, %v98_v41  }
  0x6d   :  { %1126 = vperm.xlu1 %1804, %v100_v42  }
  0x71   :  { %1136 = vperm.xlu1 %1804, %v102_v43  }
  0x81   :  { %v185_v45 = vpop.permute.xlu1 %184  ;;  %v2018_v46 = vpop.permute.xlu0 %192 }
  0x82   :  { %v234_v17 = vmul.f32 %v2034_v4, %v185_v45  ;;  %v391_v18 = vmul.f32 %v2036_v5, %v185_v45  ;;  %v233_v22 = vmul.f32 %v2042_v8, %v185_v45  ;;  %v390_v23 = vmul.f32 %v2044_v9, %v185_v45 }
  0x83   :  { %v237_v45 = vmul.f32 %v2042_v8, %v2018_v46  ;;  %v238_v53 = vmul.f32 %v2034_v4, %v2018_v46  ;;  %v394_v54 = vmul.f32 %v2044_v9, %v2018_v46  ;;  %v395_v56 = vmul.f32 %v2036_v5, %v2018_v46 }
  0x85   :  { %v189_v48 = vpop.permute.xlu1 %188  ;;  %v2020_v49 = vpop.permute.xlu0 %200 }
  0x86   :  { %v236_v26 = vmul.f32 %v2034_v4, %v189_v48  ;;  %v393_v27 = vmul.f32 %v2036_v5, %v189_v48  ;;  %v235_v32 = vmul.f32 %v2042_v8, %v189_v48  ;;  %v392_v33 = vmul.f32 %v2044_v9, %v189_v48 }
  0x89   :  { %v2028_v55 = vpop.permute.xlu0 %208 }
  0x8a   :  { %v2030_v57 = vpop.permute.xlu1 %125 }
  0x8b   :  { %v173_v58 = vmul.f32 %v2046_v10, %v2030_v57 }
  0x8e   :  { %v111_v2 = vpop.permute.xlu0 %110 }
  0x8f   :  { %v2032_v3 = vpop.permute.xlu1 %196  ;;  %v168_v12 = vmul.f32 %v2038_v6, %v111_v2  ;;  %v357_v13 = vmul.f32 %v2040_v7, %v111_v2  ;;  %v167_v15 = vmul.f32 %v2046_v10, %v111_v2  ;;  %v356_v16 = vmul.f32 %v2048_v11, %v111_v2 }
  0x90   :  { %v396_v46 = vmul.f32 %v2044_v9, %v2032_v3 }
  0x91   :  { %v250_v29 = vadd.f32 %v234_v17, %v168_v12  ;;  %v407_v30 = vadd.f32 %v391_v18, %v357_v13  ;;  %v249_v34 = vadd.f32 %v233_v22, %v167_v15  ;;  %v406_v35 = vadd.f32 %v390_v23, %v356_v16 }
  0x92   :  { %v116_v14 = vpop.permute.xlu0 %115  ;;  %v239_v13 = vmul.f32 %v2042_v8, %v2032_v3  ;;  %v397_v15 = vmul.f32 %v2036_v5, %v2032_v3 }
  0x93   :  { %v170_v19 = vmul.f32 %v2038_v6, %v116_v14  ;;  %v359_v20 = vmul.f32 %v2040_v7, %v116_v14  ;;  %v169_v24 = vmul.f32 %v2046_v10, %v116_v14  ;;  %v358_v25 = vmul.f32 %v2048_v11, %v116_v14 }
  0x94   :  { %v268_v21 = vpop.permute.xlu1 %267  ;;  %v240_v14 = vmul.f32 %v2034_v4, %v2032_v3  ;;  %v363_v3 = vmul.f32 %v2040_v7, %v2030_v57 }
  0x95   :  { %v252_v37 = vadd.f32 %v236_v26, %v170_v19  ;;  %v306_v38 = vadd.f32 %v268_v21, %v250_v29  ;;  %v409_v39 = vadd.f32 %v393_v27, %v359_v20  ;;  %v423_v40 = vadd.f32 %v407_v30, %v268_v21 }
  0x96   :  { %v121_v28 = vpop.permute.xlu0 %120  ;;  %v251_v41 = vadd.f32 %v235_v32, %v169_v24  ;;  %v305_v42 = vadd.f32 %v268_v21, %v249_v34  ;;  %v408_v43 = vadd.f32 %v392_v33, %v358_v25  ;;  %v422_v44 = vadd.f32 %v406_v35, %v268_v21 }
  0x97   :  { %v322_v60 = vmax.f32 %v306_v38, 0.0  ;;  %v439_v61 = vmax.f32 %v423_v40, 0.0  ;;  %v174_v20 = vmul.f32 %v2038_v6, %v2030_v57  ;;  %v171_v21 = vmul.f32 %v2046_v10, %v121_v28 }
  0x98   :  { %v2066_v36 = vpop.permute.xlu1 %130  ;;  %v321_v62 = vmax.f32 %v305_v42, 0.0  ;;  %v438_v63 = vmax.f32 %v422_v44, 0.0  ;;  %v172_v22 = vmul.f32 %v2038_v6, %v121_v28  ;;  %v360_v23 = vmul.f32 %v2048_v11, %v121_v28 }
  0x99   :  { %v362_v25 = vmul.f32 %v2048_v11, %v2030_v57  ;;  %v361_v26 = vmul.f32 %v2040_v7, %v121_v28  ;;  %v256_v29 = vadd.f32 %v240_v14, %v174_v20  ;;  %v255_v30 = vadd.f32 %v239_v13, %v173_v58 }
  0x9a   :  { %v273_v47 = vpop.permute.xlu0 %272  ;;  %v413_v33 = vadd.f32 %v397_v15, %v363_v3  ;;  %v253_v35 = vadd.f32 %v237_v45, %v171_v21  ;;  %v410_v38 = vadd.f32 %v394_v54, %v360_v23  ;;  %v241_v21 = vmul.f32 %v2042_v8, %v2020_v49 }
  0x9b   :  { %v308_v50 = vadd.f32 %v273_v47, %v252_v37  ;;  %v425_v51 = vadd.f32 %v409_v39, %v273_v47  ;;  %v307_v52 = vadd.f32 %v273_v47, %v251_v41  ;;  %v424_v48 = vadd.f32 %v408_v43, %v273_v47 }
  0x9c   :  { %v2078_v59 = vpop.permute.xlu1 %135  ;;  %v412_v32 = vadd.f32 %v396_v46, %v362_v25  ;;  %v254_v37 = vadd.f32 %v238_v53, %v172_v22  ;;  %v411_v42 = vadd.f32 %v395_v56, %v361_v26  ;;  %v242_v22 = vmul.f32 %v2034_v4, %v2020_v49 }
  0x9d   :  { %v324_v0 = vmax.f32 %v308_v50, 0.0  ;;  %v441_v1 = vmax.f32 %v425_v51, 0.0  ;;  %v323_v2 = vmax.f32 %v307_v52, 0.0  ;;  %v440_v12 = vmax.f32 %v424_v48, 0.0 }
  0x9e   :  { %v283_v27 = vpop.permute.xlu0 %282  ;;  %v177_v13 = vmul.f32 %v2046_v10, %v2078_v59  ;;  %v178_v14 = vmul.f32 %v2038_v6, %v2078_v59  ;;  %v366_v46 = vmul.f32 %v2048_v11, %v2078_v59  ;;  %v367_v15 = vmul.f32 %v2040_v7, %v2078_v59 }
  0x9f   :  { %v1663_v16 = vpack.c.bf16 %v324_v0, %v322_v60  ;;  %v1679_v17 = vpack.c.bf16 %v441_v1, %v439_v61  ;;  %v1665_v18 = vpack.c.bf16 %v323_v2, %v321_v62  ;;  %v1681_v19 = vpack.c.bf16 %v440_v12, %v438_v63 }
  0xa0   :  { %v312_v34 = vadd.f32 %v283_v27, %v256_v29  ;;  %v311_v39 = vadd.f32 %v283_v27, %v255_v30  ;;  %v428_v40 = vadd.f32 %v412_v32, %v283_v27  ;;  %v429_v41 = vadd.f32 %v413_v33, %v283_v27 }
  0xa1   :  { %v205_v24 = vpop.permute.xlu1 %204  ;;  %1664 = vmatprep.subr.bf16.mxu0 %v1663_v16  ;;  %1680 = vmatprep.subr.bf16.mxu1 %v1679_v17  ;;  %v398_v23 = vmul.f32 %v2044_v9, %v2020_v49  ;;  %v399_v59 = vmul.f32 %v2036_v5, %v2020_v49  ;;  %v176_v25 = vmul.f32 %v2038_v6, %v2066_v36 }
  0xa2   :  { %1666 = vmatpush1.bf16.msra.mxu0 %v1665_v18  ;;  %1682 = vmatpush1.bf16.msra.mxu1 %v1681_v19  ;;  %v328_v51 = vmax.f32 %v312_v34, 0.0  ;;  %v445_v61 = vmax.f32 %v429_v41, 0.0  ;;  %v327_v62 = vmax.f32 %v311_v39, 0.0  ;;  %v444_v45 = vmax.f32 %v428_v40, 0.0  ;;  %v293_v26 = vpop.permute.xlu0 %292 }
  0xa3   :  { %v243_v53 = vmul.f32 %v2042_v8, %v205_v24  ;;  %v244_v54 = vmul.f32 %v2034_v4, %v205_v24  ;;  %v400_v56 = vmul.f32 %v2044_v9, %v205_v24  ;;  %v401_v63 = vmul.f32 %v2036_v5, %v205_v24 }
  0xa4   :  { %v175_v24 = vmul.f32 %v2046_v10, %v2066_v36  ;;  %v364_v3 = vmul.f32 %v2048_v11, %v2066_v36  ;;  %v365_v27 = vmul.f32 %v2040_v7, %v2066_v36  ;;  %v402_v39 = vmul.f32 %v2044_v9, %v2028_v55 }
  0xa5   :  { %v259_v17 = vadd.f32 %v243_v53, %v177_v13  ;;  %v260_v18 = vadd.f32 %v244_v54, %v178_v14  ;;  %v416_v19 = vadd.f32 %v400_v56, %v366_v46  ;;  %v417_v20 = vadd.f32 %v401_v63, %v367_v15 }
  0xa6   :  { %v278_v57 = vpop.permute.xlu1 %277  ;;  %v403_v36 = vmul.f32 %v2036_v5, %v2028_v55  ;;  %v257_v41 = vadd.f32 %v241_v21, %v175_v24 }
  0xa7   :  { %v309_v43 = vadd.f32 %v278_v57, %v253_v35  ;;  %v310_v28 = vadd.f32 %v278_v57, %v254_v37  ;;  %v426_v44 = vadd.f32 %v410_v38, %v278_v57  ;;  %v427_v47 = vadd.f32 %v411_v42, %v278_v57 }
  0xa8   :  { %v315_v29 = vadd.f32 %v293_v26, %v259_v17  ;;  %v316_v30 = vadd.f32 %v293_v26, %v260_v18  ;;  %v432_v32 = vadd.f32 %v416_v19, %v293_v26  ;;  %v433_v34 = vadd.f32 %v417_v20, %v293_v26 }
  0xa9   :  { %v326_v50 = vmax.f32 %v310_v28, 0.0  ;;  %v325_v52 = vmax.f32 %v309_v43, 0.0  ;;  %v442_v48 = vmax.f32 %v426_v44, 0.0  ;;  %v443_v60 = vmax.f32 %v427_v47, 0.0 }
  0xaa   :  { %v141_v58 = vpop.permute.xlu1 %140  ;;  %v245_v37 = vmul.f32 %v2042_v8, %v2028_v55  ;;  %v246_v38 = vmul.f32 %v2034_v4, %v2028_v55  ;;  %v258_v42 = vadd.f32 %v242_v22, %v176_v25  ;;  %v414_v57 = vadd.f32 %v398_v23, %v364_v3 }
  0xab   :  { %v1667_v0 = vpack.c.bf16 %v328_v51, %v326_v50  ;;  %v1683_v1 = vpack.c.bf16 %v445_v61, %v443_v60  ;;  %v1669_v2 = vpack.c.bf16 %v327_v62, %v325_v52  ;;  %v1685_v12 = vpack.c.bf16 %v444_v45, %v442_v48 }
  0xac   :  { %v179_v49 = vmul.f32 %v2046_v10, %v141_v58  ;;  %v180_v35 = vmul.f32 %v2038_v6, %v141_v58  ;;  %v368_v40 = vmul.f32 %v2048_v11, %v141_v58  ;;  %v415_v43 = vadd.f32 %v399_v59, %v365_v27 }
  0xad   :  { %1668 = vmatprep.subr.bf16.mxu0 %v1667_v0  ;;  %1684 = vmatprep.subr.bf16.mxu1 %v1683_v1  ;;  %v332_v28 = vmax.f32 %v316_v30, 0.0  ;;  %v331_v44 = vmax.f32 %v315_v29, 0.0  ;;  %v448_v47 = vmax.f32 %v432_v32, 0.0  ;;  %v369_v50 = vmul.f32 %v2040_v7, %v141_v58 }
  0xae   :  { %v146_v16 = vpop.permute.xlu1 %145  ;;  %1670 = vmatpush1.bf16.msra.mxu0 %v1669_v2  ;;  %1686 = vmatpush1.bf16.msra.mxu1 %v1685_v12  ;;  %v261_v52 = vadd.f32 %v245_v37, %v179_v49  ;;  %v262_v48 = vadd.f32 %v246_v38, %v180_v35  ;;  %v449_v60 = vmax.f32 %v433_v34, 0.0  ;;  %v418_v63 = vadd.f32 %v402_v39, %v368_v40  ;;  %v55_v39 = vld [vmem:[%s2334_s3] sm:$0xff]  ;;  %v57_v40 = vld [vmem:[%s2334_s3 + $0x10] sm:$0xff] }
  0xaf   :  { %v181_v58 = vmul.f32 %v2046_v10, %v146_v16  ;;  %v182_v13 = vmul.f32 %v2038_v6, %v146_v16  ;;  %v419_v46 = vadd.f32 %v403_v36, %v369_v50  ;;  %v370_v17 = vmul.f32 %v2048_v11, %v146_v16  ;;  %v56_v36 = vld [vmem:[%s2334_s3 + $0x8] sm:$0xff] }
  0xb3   :  { %v213_v33 = vpop.permute.xlu1 %212 }
  0xb4   :  { %v247_v55 = vmul.f32 %v2042_v8, %v213_v33  ;;  %v248_v54 = vmul.f32 %v2034_v4, %v213_v33  ;;  %v404_v56 = vmul.f32 %v2044_v9, %v213_v33  ;;  %v405_v14 = vmul.f32 %v2036_v5, %v213_v33 }
  0xb5   :  { %v371_v8 = vmul.f32 %v2040_v7, %v146_v16 }
  0xb6   :  { %v263_v23 = vadd.f32 %v247_v55, %v181_v58  ;;  %v264_v59 = vadd.f32 %v248_v54, %v182_v13  ;;  %v420_v10 = vadd.f32 %v404_v56, %v370_v17 }
  0xb7   :  { %v421_v5 = vadd.f32 %v405_v14, %v371_v8 }
  0xb8   :  { %v288_v51 = vpop.permute.xlu1 %287 }
  0xb9   :  { %v313_v61 = vadd.f32 %v288_v51, %v257_v41  ;;  %v314_v62 = vadd.f32 %v288_v51, %v258_v42  ;;  %v430_v45 = vadd.f32 %v414_v57, %v288_v51  ;;  %v431_v53 = vadd.f32 %v415_v43, %v288_v51  ;;  %v58_v41 = vld [vmem:[%s2334_s3 + $0x18] sm:$0xff]  ;;  %v59_v42 = vld [vmem:[%s2334_s3 + $0x20] sm:$0xff]  ;;  %v60_v57 = vld [vmem:[%s2334_s3 + $0x28] sm:$0xff]  ;;  %v457_v51 = vpop.permute.xlu0 %456 }
  0xba   :  { %v61_v43 = vld [vmem:[%s2334_s3 + $0x30] sm:$0xff] }
  0xbb   :  { %v330_v0 = vmax.f32 %v314_v62, 0.0  ;;  %v447_v1 = vmax.f32 %v431_v53, 0.0  ;;  %v329_v2 = vmax.f32 %v313_v61, 0.0  ;;  %v446_v12 = vmax.f32 %v430_v45, 0.0 }
  0xbc   :  { %v298_v15 = vpop.permute.xlu1 %297 }
  0xbd   :  { %v317_v4 = vadd.f32 %v298_v15, %v261_v52  ;;  %v318_v18 = vadd.f32 %v298_v15, %v262_v48  ;;  %v1671_v9 = vpack.c.bf16 %v332_v28, %v330_v0  ;;  %v1687_v19 = vpack.c.bf16 %v449_v60, %v447_v1  ;;  %v62_v28 = vld [vmem:[%s2334_s3 + $0x38] sm:$0xff] }
  0xbe   :  { %v1673_v20 = vpack.c.bf16 %v331_v44, %v329_v2  ;;  %v1689_v21 = vpack.c.bf16 %v448_v47, %v446_v12  ;;  %v434_v22 = vadd.f32 %v418_v63, %v298_v15  ;;  %v435_v24 = vadd.f32 %v419_v46, %v298_v15 }
  0xbf   :  { %1672 = vmatprep.subr.bf16.mxu0 %v1671_v9  ;;  %1688 = vmatprep.subr.bf16.mxu1 %v1687_v19  ;;  %v334_v3 = vmax.f32 %v318_v18, 0.0  ;;  %v333_v26 = vmax.f32 %v317_v4, 0.0 }
  0xc0   :  { %v303_v6 = vpop.permute.xlu1 %302  ;;  %1674 = vmatpush1.bf16.msra.mxu0 %v1673_v20  ;;  %1690 = vmatpush1.bf16.msra.mxu1 %v1689_v21  ;;  %v450_v30 = vmax.f32 %v434_v22, 0.0  ;;  %v451_v33 = vmax.f32 %v435_v24, 0.0  ;;  %v467_v20 = vpop.permute.xlu0 %466 }
  0xc1   :  { %v319_v11 = vadd.f32 %v303_v6, %v263_v23  ;;  %v320_v25 = vadd.f32 %v303_v6, %v264_v59  ;;  %v436_v7 = vadd.f32 %v420_v10, %v303_v6  ;;  %v437_v16 = vadd.f32 %v421_v5, %v303_v6 }
  0xc3   :  { %v336_v27 = vmax.f32 %v320_v25, 0.0  ;;  %v335_v29 = vmax.f32 %v319_v11, 0.0  ;;  %v452_v32 = vmax.f32 %v436_v7, 0.0  ;;  %v453_v34 = vmax.f32 %v437_v16, 0.0 }
  0xc4   :  { %v462_v60 = vpop.permute.xlu1 %461 }
  0xc5   :  { %v1675_v49 = vpack.c.bf16 %v336_v27, %v334_v3  ;;  %v1677_v35 = vpack.c.bf16 %v335_v29, %v333_v26  ;;  %v1693_v37 = vpack.c.bf16 %v452_v32, %v450_v30  ;;  %v1691_v38 = vpack.c.bf16 %v453_v34, %v451_v33 }
  0xc7   :  { %1676 = vmatprep.subr.bf16.mxu0 %v1675_v49  ;;  %1692 = vmatprep.subr.bf16.mxu1 %v1691_v38 }
  0xc8   :  { %1678 = vmatpush1.bf16.msra.mxu0 %v1677_v35  ;;  %1694 = vmatpush1.bf16.msra.mxu1 %v1693_v37  ;;  %v472_v24 = vpop.permute.xlu1 %471 }
  0xcb   :  { %1611 = vmatmul.mubr.msk.f32.vlgmr.msra.gmra.mrb[0].mxu0 %vm494_vm0, %v55_v39  ;;  %1619 = vmatmul.mubr.msk.f32.vlgmr.msra.gmra.mrb[0].mxu1 %vm494_vm0, %v55_v39 }
  0xcc   :  { %589 = vmatprep.mubr.f32.mxu0 %v1831_v31  ;;  %702 = vmatprep.mubr.f32.mxu1 %v1831_v31 }
  0xcf   :  { %1612 = vmatmul.mubr.msk.f32.gmra.mrb[2].mxu0 %vm494_vm0, %v56_v36  ;;  %1620 = vmatmul.mubr.msk.f32.gmra.mrb[2].mxu1 %vm494_vm0, %v56_v36 }
  0xd0   :  { %595 = vmatprep.mubr.f32.mxu0 %v1831_v31  ;;  %708 = vmatprep.mubr.f32.mxu1 %v1831_v31 }
  0xd3   :  { %1613 = vmatmul.mubr.msk.f32.gmra.mrb[4].mxu0 %vm494_vm0, %v57_v40  ;;  %1621 = vmatmul.mubr.msk.f32.gmra.mrb[4].mxu1 %vm494_vm0, %v57_v40 }
  0xd4   :  { %601 = vmatprep.mubr.f32.mxu0 %v1831_v31  ;;  %714 = vmatprep.mubr.f32.mxu1 %v1831_v31 }
  0xd7   :  { %1614 = vmatmul.mubr.msk.f32.gmra.mrb[6].mxu0 %vm494_vm0, %v58_v41  ;;  %1622 = vmatmul.mubr.msk.f32.gmra.mrb[6].mxu1 %vm494_vm0, %v58_v41 }
  0xd8   :  { %607 = vmatprep.mubr.f32.mxu0 %v1831_v31  ;;  %720 = vmatprep.mubr.f32.mxu1 %v1831_v31 }
  0xdb   :  { %1615 = vmatmul.mubr.msk.f32.gmra.mrb[8].mxu0 %vm494_vm0, %v59_v42  ;;  %1623 = vmatmul.mubr.msk.f32.gmra.mrb[8].mxu1 %vm494_vm0, %v59_v42 }
  0xdc   :  { %613 = vmatprep.mubr.f32.mxu0 %v1831_v31  ;;  %726 = vmatprep.mubr.f32.mxu1 %v1831_v31 }
  0xdf   :  { %1616 = vmatmul.mubr.msk.f32.gmra.mrb[10].mxu0 %vm494_vm0, %v60_v57  ;;  %1624 = vmatmul.mubr.msk.f32.gmra.mrb[10].mxu1 %vm494_vm0, %v60_v57  ;;  %v477_v57 = vpop.permute.xlu0 %476 }
  0xe0   :  { %619 = vmatprep.mubr.f32.mxu0 %v1831_v31  ;;  %732 = vmatprep.mubr.f32.mxu1 %v1831_v31 }
  0xe3   :  { %1617 = vmatmul.mubr.msk.f32.gmra.mrb[12].mxu0 %vm494_vm0, %v61_v43  ;;  %1625 = vmatmul.mubr.msk.f32.gmra.mrb[12].mxu1 %vm494_vm0, %v61_v43 }
  0xe4   :  { %625 = vmatprep.mubr.f32.mxu0 %v1831_v31  ;;  %738 = vmatprep.mubr.f32.mxu1 %v1831_v31 }
  0xe7   :  { %1618 = vmatmul.mubr.msk.f32.gmra.mrb[14].mxu0 %vm494_vm0, %v62_v28  ;;  %1626 = vmatmul.mubr.msk.f32.gmra.mrb[14].mxu1 %vm494_vm0, %v62_v28 }
  0xe8   :  { %905 = vmatprep.mubr.f32.mxu0 %v1831_v31  ;;  %1018 = vmatprep.mubr.f32.mxu1 %v1831_v31 }
 0x19e   :  { %v585_v44 = vpop.f32.mrb[0].mxu0  ;;  %v698_v47 = vpop.f32.mrb[0].mxu1 }
 0x19f   :  { %v587_v50 = vpop.f32.mrb[1].mxu0  ;;  %v700_v52 = vpop.f32.mrb[1].mxu1  ;;  %v586_v48 = vadd.f32 %v585_v44, %v457_v51  ;;  %v699_v61 = vadd.f32 %v698_v47, %v457_v51 }
 0x1a0   :  { %v588_v62 = vadd.f32 %v587_v50, %v457_v51  ;;  %v701_v53 = vadd.f32 %v700_v52, %v457_v51  ;;  %v482_v51 = vpop.permute.xlu1 %481 }
 0x1a1   :  { %v745_v2 = vmax.f32 %v586_v48, 0.0  ;;  %v761_v13 = vmax.f32 %v699_v61, 0.0 }
 0x1a2   :  { %v591_v45 = vpop.f32.mrb[2].mxu0  ;;  %v704_v54 = vpop.f32.mrb[2].mxu1  ;;  %v746_v14 = vmax.f32 %v588_v62, 0.0  ;;  %v762_v8 = vmax.f32 %v701_v53, 0.0 }
 0x1a3   :  { %v592_v55 = vadd.f32 %v591_v45, %v462_v60  ;;  %v593_v56 = vpop.f32.mrb[3].mxu0  ;;  %v705_v63 = vadd.f32 %v704_v54, %v462_v60  ;;  %v706_v1 = vpop.f32.mrb[3].mxu1 }
 0x1a4   :  { %v594_v0 = vadd.f32 %v593_v56, %v462_v60  ;;  %v707_v58 = vadd.f32 %v706_v1, %v462_v60 }
 0x1a5   :  { %v747_v12 = vmax.f32 %v592_v55, 0.0  ;;  %v763_v46 = vmax.f32 %v705_v63, 0.0 }
 0x1a6   :  { %v748_v15 = vmax.f32 %v594_v0, 0.0  ;;  %v597_v17 = vpop.f32.mrb[4].mxu0  ;;  %v764_v18 = vmax.f32 %v707_v58, 0.0  ;;  %v710_v9 = vpop.f32.mrb[4].mxu1 }
 0x1a7   :  { %v1697_v4 = vpack.c.bf16 %v747_v12, %v745_v2  ;;  %v599_v19 = vpop.f32.mrb[5].mxu0  ;;  %v1713_v21 = vpack.c.bf16 %v763_v46, %v761_v13  ;;  %v712_v23 = vpop.f32.mrb[5].mxu1  ;;  %v598_v10 = vadd.f32 %v597_v17, %v467_v20  ;;  %v711_v5 = vadd.f32 %v710_v9, %v467_v20 }
 0x1a8   :  { %v1695_v22 = vpack.c.bf16 %v748_v15, %v746_v14  ;;  %v1711_v59 = vpack.c.bf16 %v764_v18, %v762_v8  ;;  %v600_v6 = vadd.f32 %v599_v19, %v467_v20  ;;  %v713_v25 = vadd.f32 %v712_v23, %v467_v20  ;;  %v487_v18 = vpop.permute.xlu0 %486  ;;  %v492_v23 = vpop.permute.xlu1 %491 }
 0x1a9   :  { %v749_v30 = vmax.f32 %v598_v10, 0.0  ;;  %v765_v34 = vmax.f32 %v711_v5, 0.0 }
 0x1aa   :  { %v603_v11 = vpop.f32.mrb[6].mxu0  ;;  %1696 = vmatprep.subr.bf16.mxu0 %v1695_v22  ;;  %v716_v16 = vpop.f32.mrb[6].mxu1  ;;  %1712 = vmatprep.subr.bf16.mxu1 %v1711_v59  ;;  %v750_v49 = vmax.f32 %v600_v6, 0.0  ;;  %v766_v39 = vmax.f32 %v713_v25, 0.0 }
 0x1ab   :  { %v604_v7 = vadd.f32 %v603_v11, %v472_v24  ;;  %v605_v3 = vpop.f32.mrb[7].mxu0  ;;  %1698 = vmatpush1.bf16.msra.mxu0 %v1697_v4  ;;  %v717_v26 = vadd.f32 %v716_v16, %v472_v24  ;;  %v718_v29 = vpop.f32.mrb[7].mxu1  ;;  %1714 = vmatpush1.bf16.msra.mxu1 %v1713_v21 }
 0x1ac   :  { %v606_v27 = vadd.f32 %v605_v3, %v472_v24  ;;  %v719_v33 = vadd.f32 %v718_v29, %v472_v24 }
 0x1ad   :  { %v751_v32 = vmax.f32 %v604_v7, 0.0  ;;  %v767_v35 = vmax.f32 %v717_v26, 0.0 }
 0x1ae   :  { %v752_v37 = vmax.f32 %v606_v27, 0.0  ;;  %v609_v38 = vpop.f32.mrb[8].mxu0  ;;  %v768_v40 = vmax.f32 %v719_v33, 0.0  ;;  %v722_v41 = vpop.f32.mrb[8].mxu1 }
 0x1af   :  { %v1701_v36 = vpack.c.bf16 %v751_v32, %v749_v30  ;;  %v611_v42 = vpop.f32.mrb[9].mxu0  ;;  %v1717_v43 = vpack.c.bf16 %v767_v35, %v765_v34  ;;  %v724_v44 = vpop.f32.mrb[9].mxu1  ;;  %v610_v50 = vadd.f32 %v609_v38, %v477_v57  ;;  %v723_v52 = vadd.f32 %v722_v41, %v477_v57  ;;  %v72_v41 = vld [vmem:[%s2336_s5 + $0x8] sm:$0xff] }
 0x1b0   :  { %v1699_v28 = vpack.c.bf16 %v752_v37, %v750_v49  ;;  %v1715_v47 = vpack.c.bf16 %v768_v40, %v766_v39  ;;  %v612_v48 = vadd.f32 %v611_v42, %v477_v57  ;;  %v725_v61 = vadd.f32 %v724_v44, %v477_v57  ;;  %v71_v40 = vld [vmem:[%s2336_s5] sm:$0xff]  ;;  %v73_v42 = vld [vmem:[%s2336_s5 + $0x10] sm:$0xff]  ;;  %v74_v57 = vld [vmem:[%s2336_s5 + $0x18] sm:$0xff] }
 0x1b1   :  { %v753_v63 = vmax.f32 %v610_v50, 0.0  ;;  %v769_v2 = vmax.f32 %v723_v52, 0.0  ;;  %v77_v44 = vld [vmem:[%s2336_s5 + $0x30] sm:$0xff] }
 0x1b2   :  { %v615_v60 = vpop.f32.mrb[10].mxu0  ;;  %1700 = vmatprep.subr.bf16.mxu0 %v1699_v28  ;;  %v728_v45 = vpop.f32.mrb[10].mxu1  ;;  %1716 = vmatprep.subr.bf16.mxu1 %v1715_v47  ;;  %v754_v12 = vmax.f32 %v612_v48, 0.0  ;;  %v770_v46 = vmax.f32 %v725_v61, 0.0  ;;  %v76_v28 = vld [vmem:[%s2336_s5 + $0x28] sm:$0xff]  ;;  %v78_v47 = vld [vmem:[%s2336_s5 + $0x38] sm:$0xff] }
 0x1b3   :  { %v616_v62 = vadd.f32 %v615_v60, %v482_v51  ;;  %v617_v53 = vpop.f32.mrb[11].mxu0  ;;  %1702 = vmatpush1.bf16.msra.mxu0 %v1701_v36  ;;  %v729_v55 = vadd.f32 %v728_v45, %v482_v51  ;;  %v730_v56 = vpop.f32.mrb[11].mxu1  ;;  %1718 = vmatpush1.bf16.msra.mxu1 %v1717_v43  ;;  %v75_v43 = vld [vmem:[%s2336_s5 + $0x20] sm:$0xff] }
 0x1b4   :  { %v618_v54 = vadd.f32 %v617_v53, %v482_v51  ;;  %v731_v1 = vadd.f32 %v730_v56, %v482_v51  ;;  %v780_v48 = vpop.permute.xlu0 %779 }
 0x1b5   :  { %v755_v0 = vmax.f32 %v616_v62, 0.0  ;;  %v771_v58 = vmax.f32 %v729_v55, 0.0  ;;  %v785_v62 = vpop.permute.xlu1 %784 }
 0x1b6   :  { %v756_v13 = vmax.f32 %v618_v54, 0.0  ;;  %v621_v14 = vpop.f32.mrb[12].mxu0  ;;  %v772_v17 = vmax.f32 %v731_v1, 0.0  ;;  %v734_v8 = vpop.f32.mrb[12].mxu1 }
 0x1b7   :  { %v1705_v15 = vpack.c.bf16 %v755_v0, %v753_v63  ;;  %v623_v4 = vpop.f32.mrb[13].mxu0  ;;  %v1721_v9 = vpack.c.bf16 %v771_v58, %v769_v2  ;;  %v736_v20 = vpop.f32.mrb[13].mxu1  ;;  %v622_v22 = vadd.f32 %v621_v14, %v487_v18  ;;  %v735_v59 = vadd.f32 %v734_v8, %v487_v18 }
 0x1b8   :  { %v1703_v19 = vpack.c.bf16 %v756_v13, %v754_v12  ;;  %v1719_v21 = vpack.c.bf16 %v772_v17, %v770_v46  ;;  %v624_v10 = vadd.f32 %v623_v4, %v487_v18  ;;  %v737_v5 = vadd.f32 %v736_v20, %v487_v18 }
 0x1b9   :  { %v757_v26 = vmax.f32 %v622_v22, 0.0  ;;  %v773_v30 = vmax.f32 %v735_v59, 0.0  ;;  %v790_v22 = vpop.permute.xlu0 %789 }
 0x1ba   :  { %v627_v24 = vpop.f32.mrb[14].mxu0  ;;  %1704 = vmatprep.subr.bf16.mxu0 %v1703_v19  ;;  %v740_v11 = vpop.f32.mrb[14].mxu1  ;;  %1720 = vmatprep.subr.bf16.mxu1 %v1719_v21  ;;  %v758_v32 = vmax.f32 %v624_v10, 0.0  ;;  %v774_v49 = vmax.f32 %v737_v5, 0.0 }
 0x1bb   :  { %v628_v6 = vadd.f32 %v627_v24, %v492_v23  ;;  %v629_v25 = vpop.f32.mrb[15].mxu0  ;;  %1706 = vmatpush1.bf16.msra.mxu0 %v1705_v15  ;;  %v741_v7 = vadd.f32 %v740_v11, %v492_v23  ;;  %v742_v3 = vpop.f32.mrb[15].mxu1  ;;  %1722 = vmatpush1.bf16.msra.mxu1 %v1721_v9 }
 0x1bc   :  { %v630_v16 = vadd.f32 %v629_v25, %v492_v23  ;;  %v743_v29 = vadd.f32 %v742_v3, %v492_v23 }
 0x1bd   :  { %v759_v27 = vmax.f32 %v628_v6, 0.0  ;;  %v775_v33 = vmax.f32 %v741_v7, 0.0  ;;  %v795_v6 = vpop.permute.xlu1 %794 }
 0x1be   :  { %v760_v34 = vmax.f32 %v630_v16, 0.0  ;;  %v776_v37 = vmax.f32 %v743_v29, 0.0 }
 0x1bf   :  { %v1709_v35 = vpack.c.bf16 %v759_v27, %v757_v26  ;;  %v1725_v38 = vpack.c.bf16 %v775_v33, %v773_v30 }
 0x1c0   :  { %v1707_v39 = vpack.c.bf16 %v760_v34, %v758_v32  ;;  %v1723_v36 = vpack.c.bf16 %v776_v37, %v774_v49 }
 0x1c2   :  { %1708 = vmatprep.subr.bf16.mxu0 %v1707_v39  ;;  %1724 = vmatprep.subr.bf16.mxu1 %v1723_v36 }
 0x1c3   :  { %1710 = vmatpush1.bf16.msra.mxu0 %v1709_v35  ;;  %1726 = vmatpush1.bf16.msra.mxu1 %v1725_v38 }
 0x1c6   :  { %1627 = vmatmul.mubr.msk.f32.vlgmr.msra.gmra.mrb[16].mxu0 %vm494_vm0, %v71_v40  ;;  %1635 = vmatmul.mubr.msk.f32.vlgmr.msra.gmra.mrb[16].mxu1 %vm494_vm0, %v71_v40 }
 0x1c7   :  { %911 = vmatprep.mubr.f32.mxu0 %v1831_v31  ;;  %1024 = vmatprep.mubr.f32.mxu1 %v1831_v31 }
 0x1ca   :  { %1628 = vmatmul.mubr.msk.f32.gmra.mrb[18].mxu0 %vm494_vm0, %v72_v41  ;;  %1636 = vmatmul.mubr.msk.f32.gmra.mrb[18].mxu1 %vm494_vm0, %v72_v41 }
 0x1cb   :  { %917 = vmatprep.mubr.f32.mxu0 %v1831_v31  ;;  %1030 = vmatprep.mubr.f32.mxu1 %v1831_v31 }
 0x1ce   :  { %1629 = vmatmul.mubr.msk.f32.gmra.mrb[20].mxu0 %vm494_vm0, %v73_v42  ;;  %1637 = vmatmul.mubr.msk.f32.gmra.mrb[20].mxu1 %vm494_vm0, %v73_v42 }
 0x1cf   :  { %923 = vmatprep.mubr.f32.mxu0 %v1831_v31  ;;  %1036 = vmatprep.mubr.f32.mxu1 %v1831_v31 }
 0x1d2   :  { %1630 = vmatmul.mubr.msk.f32.gmra.mrb[22].mxu0 %vm494_vm0, %v74_v57  ;;  %1638 = vmatmul.mubr.msk.f32.gmra.mrb[22].mxu1 %vm494_vm0, %v74_v57 }
 0x1d3   :  { %929 = vmatprep.mubr.f32.mxu0 %v1831_v31  ;;  %1042 = vmatprep.mubr.f32.mxu1 %v1831_v31 }
 0x1d6   :  { %1631 = vmatmul.mubr.msk.f32.gmra.mrb[24].mxu0 %vm494_vm0, %v75_v43  ;;  %1639 = vmatmul.mubr.msk.f32.gmra.mrb[24].mxu1 %vm494_vm0, %v75_v43 }
 0x1d7   :  { %935 = vmatprep.mubr.f32.mxu0 %v1831_v31  ;;  %1048 = vmatprep.mubr.f32.mxu1 %v1831_v31 }
 0x1da   :  { %1632 = vmatmul.mubr.msk.f32.gmra.mrb[26].mxu0 %vm494_vm0, %v76_v28  ;;  %1640 = vmatmul.mubr.msk.f32.gmra.mrb[26].mxu1 %vm494_vm0, %v76_v28  ;;  %v800_v28 = vpop.permute.xlu0 %799 }
 0x1db   :  { %941 = vmatprep.mubr.f32.mxu0 %v1831_v31  ;;  %1054 = vmatprep.mubr.f32.mxu1 %v1831_v31 }
 0x1de   :  { %1633 = vmatmul.mubr.msk.f32.gmra.mrb[28].mxu0 %vm494_vm0, %v77_v44  ;;  %1641 = vmatmul.mubr.msk.f32.gmra.mrb[28].mxu1 %vm494_vm0, %v77_v44 }
 0x1df   :  { %947 = vmatprep.mubr.f32.mxu0 %v1831_v31  ;;  %1060 = vmatprep.mubr.f32.mxu1 %v1831_v31 }
 0x1e2   :  { %1634 = vmatmul.mubr.msk.f32.gmra.mrb[30].mxu0 %vm494_vm0, %v78_v47  ;;  %1642 = vmatmul.mubr.msk.f32.gmra.mrb[30].mxu1 %vm494_vm0, %v78_v47 }
 0x1e3   :  { %1227 = vmatprep.mubr.f32.mxu0 %v1831_v31  ;;  %1340 = vmatprep.mubr.f32.mxu1 %v1831_v31 }
 0x299   :  { %v907_v50 = vpop.f32.mrb[16].mxu0  ;;  %v1020_v51 = vpop.f32.mrb[16].mxu1 }
 0x29a   :  { %v909_v52 = vpop.f32.mrb[17].mxu0  ;;  %v1022_v60 = vpop.f32.mrb[17].mxu1  ;;  %v908_v61 = vadd.f32 %v907_v50, %v780_v48  ;;  %v1021_v45 = vadd.f32 %v1020_v51, %v780_v48 }
 0x29b   :  { %v910_v53 = vadd.f32 %v909_v52, %v780_v48  ;;  %v1023_v54 = vadd.f32 %v1022_v60, %v780_v48  ;;  %v805_v48 = vpop.permute.xlu1 %804 }
 0x29c   :  { %v1067_v58 = vmax.f32 %v908_v61, 0.0  ;;  %v1083_v46 = vmax.f32 %v1021_v45, 0.0 }
 0x29d   :  { %v913_v55 = vpop.f32.mrb[18].mxu0  ;;  %v1026_v63 = vpop.f32.mrb[18].mxu1  ;;  %v1068_v15 = vmax.f32 %v910_v53, 0.0  ;;  %v1084_v18 = vmax.f32 %v1023_v54, 0.0 }
 0x29e   :  { %v914_v56 = vadd.f32 %v913_v55, %v785_v62  ;;  %v915_v0 = vpop.f32.mrb[19].mxu0  ;;  %v1027_v1 = vadd.f32 %v1026_v63, %v785_v62  ;;  %v1028_v12 = vpop.f32.mrb[19].mxu1 }
 0x29f   :  { %v916_v2 = vadd.f32 %v915_v0, %v785_v62  ;;  %v1029_v14 = vadd.f32 %v1028_v12, %v785_v62 }
 0x2a0   :  { %v1069_v13 = vmax.f32 %v914_v56, 0.0  ;;  %v1085_v17 = vmax.f32 %v1027_v1, 0.0 }
 0x2a1   :  { %v1070_v8 = vmax.f32 %v916_v2, 0.0  ;;  %v919_v4 = vpop.f32.mrb[20].mxu0  ;;  %v1086_v19 = vmax.f32 %v1029_v14, 0.0  ;;  %v1032_v20 = vpop.f32.mrb[20].mxu1 }
 0x2a2   :  { %v1729_v9 = vpack.c.bf16 %v1069_v13, %v1067_v58  ;;  %v921_v21 = vpop.f32.mrb[21].mxu0  ;;  %v1745_v23 = vpack.c.bf16 %v1085_v17, %v1083_v46  ;;  %v1034_v10 = vpop.f32.mrb[21].mxu1  ;;  %v920_v5 = vadd.f32 %v919_v4, %v790_v22  ;;  %v1033_v11 = vadd.f32 %v1032_v20, %v790_v22 }
 0x2a3   :  { %v1727_v59 = vpack.c.bf16 %v1070_v8, %v1068_v15  ;;  %v1743_v24 = vpack.c.bf16 %v1086_v19, %v1084_v18  ;;  %v922_v25 = vadd.f32 %v921_v21, %v790_v22  ;;  %v1035_v16 = vadd.f32 %v1034_v10, %v790_v22  ;;  %v810_v19 = vpop.permute.xlu0 %809  ;;  %v815_v10 = vpop.permute.xlu1 %814 }
 0x2a4   :  { %v1071_v33 = vmax.f32 %v920_v5, 0.0  ;;  %v1087_v35 = vmax.f32 %v1033_v11, 0.0 }
 0x2a5   :  { %v925_v7 = vpop.f32.mrb[22].mxu0  ;;  %1728 = vmatprep.subr.bf16.mxu0 %v1727_v59  ;;  %v1038_v26 = vpop.f32.mrb[22].mxu1  ;;  %1744 = vmatprep.subr.bf16.mxu1 %v1743_v24  ;;  %v1072_v37 = vmax.f32 %v922_v25, 0.0  ;;  %v1088_v40 = vmax.f32 %v1035_v16, 0.0 }
 0x2a6   :  { %v926_v3 = vadd.f32 %v925_v7, %v795_v6  ;;  %v927_v27 = vpop.f32.mrb[23].mxu0  ;;  %1730 = vmatpush1.bf16.msra.mxu0 %v1729_v9  ;;  %v1039_v29 = vadd.f32 %v1038_v26, %v795_v6  ;;  %v1040_v32 = vpop.f32.mrb[23].mxu1  ;;  %1746 = vmatpush1.bf16.msra.mxu1 %v1745_v23 }
 0x2a7   :  { %v928_v30 = vadd.f32 %v927_v27, %v795_v6  ;;  %v1041_v49 = vadd.f32 %v1040_v32, %v795_v6 }
 0x2a8   :  { %v1073_v34 = vmax.f32 %v926_v3, 0.0  ;;  %v1089_v38 = vmax.f32 %v1039_v29, 0.0 }
 0x2a9   :  { %v1074_v39 = vmax.f32 %v928_v30, 0.0  ;;  %v931_v36 = vpop.f32.mrb[24].mxu0  ;;  %v1090_v42 = vmax.f32 %v1041_v49, 0.0  ;;  %v1044_v57 = vpop.f32.mrb[24].mxu1 }
 0x2aa   :  { %v1733_v41 = vpack.c.bf16 %v1073_v34, %v1071_v33  ;;  %v933_v43 = vpop.f32.mrb[25].mxu0  ;;  %v1749_v44 = vpack.c.bf16 %v1089_v38, %v1087_v35  ;;  %v1046_v50 = vpop.f32.mrb[25].mxu1  ;;  %v932_v52 = vadd.f32 %v931_v36, %v800_v28  ;;  %v1045_v60 = vadd.f32 %v1044_v57, %v800_v28  ;;  %v88_v57 = vld [vmem:[%s2338_s7 + $0x8] sm:$0xff] }
 0x2ab   :  { %v1731_v47 = vpack.c.bf16 %v1074_v39, %v1072_v37  ;;  %v1747_v51 = vpack.c.bf16 %v1090_v42, %v1088_v40  ;;  %v934_v61 = vadd.f32 %v933_v43, %v800_v28  ;;  %v1047_v45 = vadd.f32 %v1046_v50, %v800_v28  ;;  %v87_v42 = vld [vmem:[%s2338_s7] sm:$0xff]  ;;  %v89_v43 = vld [vmem:[%s2338_s7 + $0x10] sm:$0xff]  ;;  %v90_v28 = vld [vmem:[%s2338_s7 + $0x18] sm:$0xff] }
 0x2ac   :  { %v1075_v1 = vmax.f32 %v932_v52, 0.0  ;;  %v1091_v58 = vmax.f32 %v1045_v60, 0.0  ;;  %v93_v50 = vld [vmem:[%s2338_s7 + $0x30] sm:$0xff] }
 0x2ad   :  { %v937_v62 = vpop.f32.mrb[26].mxu0  ;;  %1732 = vmatprep.subr.bf16.mxu0 %v1731_v47  ;;  %v1050_v55 = vpop.f32.mrb[26].mxu1  ;;  %1748 = vmatprep.subr.bf16.mxu1 %v1747_v51  ;;  %v1076_v13 = vmax.f32 %v934_v61, 0.0  ;;  %v1092_v17 = vmax.f32 %v1047_v45, 0.0  ;;  %v92_v47 = vld [vmem:[%s2338_s7 + $0x28] sm:$0xff]  ;;  %v94_v51 = vld [vmem:[%s2338_s7 + $0x38] sm:$0xff] }
 0x2ae   :  { %v938_v53 = vadd.f32 %v937_v62, %v805_v48  ;;  %v939_v54 = vpop.f32.mrb[27].mxu0  ;;  %1734 = vmatpush1.bf16.msra.mxu0 %v1733_v41  ;;  %v1051_v56 = vadd.f32 %v1050_v55, %v805_v48  ;;  %v1052_v0 = vpop.f32.mrb[27].mxu1  ;;  %1750 = vmatpush1.bf16.msra.mxu1 %v1749_v44  ;;  %v91_v44 = vld [vmem:[%s2338_s7 + $0x20] sm:$0xff] }
 0x2af   :  { %v940_v63 = vadd.f32 %v939_v54, %v805_v48  ;;  %v1053_v12 = vadd.f32 %v1052_v0, %v805_v48  ;;  %v1102_v61 = vpop.permute.xlu0 %1101 }
 0x2b0   :  { %v1077_v2 = vmax.f32 %v938_v53, 0.0  ;;  %v1093_v14 = vmax.f32 %v1051_v56, 0.0  ;;  %v1107_v53 = vpop.permute.xlu1 %1106 }
 0x2b1   :  { %v1078_v46 = vmax.f32 %v940_v63, 0.0  ;;  %v943_v15 = vpop.f32.mrb[28].mxu0  ;;  %v1094_v4 = vmax.f32 %v1053_v12, 0.0  ;;  %v1056_v18 = vpop.f32.mrb[28].mxu1 }
 0x2b2   :  { %v1737_v8 = vpack.c.bf16 %v1077_v2, %v1075_v1  ;;  %v945_v9 = vpop.f32.mrb[29].mxu0  ;;  %v1753_v20 = vpack.c.bf16 %v1093_v14, %v1091_v58  ;;  %v1058_v22 = vpop.f32.mrb[29].mxu1  ;;  %v944_v59 = vadd.f32 %v943_v15, %v810_v19  ;;  %v1057_v24 = vadd.f32 %v1056_v18, %v810_v19 }
 0x2b3   :  { %v1735_v21 = vpack.c.bf16 %v1078_v46, %v1076_v13  ;;  %v1751_v23 = vpack.c.bf16 %v1094_v4, %v1092_v17  ;;  %v946_v5 = vadd.f32 %v945_v9, %v810_v19  ;;  %v1059_v11 = vadd.f32 %v1058_v22, %v810_v19 }
 0x2b4   :  { %v1079_v29 = vmax.f32 %v944_v59, 0.0  ;;  %v1095_v33 = vmax.f32 %v1057_v24, 0.0 }
 0x2b5   :  { %v949_v6 = vpop.f32.mrb[30].mxu0  ;;  %1736 = vmatprep.subr.bf16.mxu0 %v1735_v21  ;;  %v1062_v7 = vpop.f32.mrb[30].mxu1  ;;  %1752 = vmatprep.subr.bf16.mxu1 %v1751_v23  ;;  %v1080_v34 = vmax.f32 %v946_v5, 0.0  ;;  %v1096_v37 = vmax.f32 %v1059_v11, 0.0 }
 0x2b6   :  { %v950_v25 = vadd.f32 %v949_v6, %v815_v10  ;;  %v951_v16 = vpop.f32.mrb[31].mxu0  ;;  %1738 = vmatpush1.bf16.msra.mxu0 %v1737_v8  ;;  %v1063_v3 = vadd.f32 %v1062_v7, %v815_v10  ;;  %v1064_v27 = vpop.f32.mrb[31].mxu1  ;;  %1754 = vmatpush1.bf16.msra.mxu1 %v1753_v20 }
 0x2b7   :  { %v952_v26 = vadd.f32 %v951_v16, %v815_v10  ;;  %v1065_v32 = vadd.f32 %v1064_v27, %v815_v10  ;;  %v1112_v23 = vpop.permute.xlu0 %1111  ;;  %v1117_v11 = vpop.permute.xlu1 %1116 }
 0x2b8   :  { %v1081_v30 = vmax.f32 %v950_v25, 0.0  ;;  %v1097_v49 = vmax.f32 %v1063_v3, 0.0 }
 0x2b9   :  { %v1082_v35 = vmax.f32 %v952_v26, 0.0  ;;  %v1098_v39 = vmax.f32 %v1065_v32, 0.0 }
 0x2ba   :  { %v1741_v38 = vpack.c.bf16 %v1081_v30, %v1079_v29  ;;  %v1757_v36 = vpack.c.bf16 %v1097_v49, %v1095_v33 }
 0x2bb   :  { %v1739_v40 = vpack.c.bf16 %v1082_v35, %v1080_v34  ;;  %v1755_v41 = vpack.c.bf16 %v1098_v39, %v1096_v37 }
 0x2bd   :  { %1740 = vmatprep.subr.bf16.mxu0 %v1739_v40  ;;  %1756 = vmatprep.subr.bf16.mxu1 %v1755_v41 }
 0x2be   :  { %1742 = vmatpush1.bf16.msra.mxu0 %v1741_v38  ;;  %1758 = vmatpush1.bf16.msra.mxu1 %v1757_v36 }
 0x2c1   :  { %1643 = vmatmul.mubr.msk.f32.vlgmr.msra.gmra.mrb[32].mxu0 %vm494_vm0, %v87_v42  ;;  %1651 = vmatmul.mubr.msk.f32.vlgmr.msra.gmra.mrb[32].mxu1 %vm494_vm0, %v87_v42 }
 0x2c2   :  { %1233 = vmatprep.mubr.f32.mxu0 %v1831_v31  ;;  %1346 = vmatprep.mubr.f32.mxu1 %v1831_v31 }
 0x2c5   :  { %1644 = vmatmul.mubr.msk.f32.gmra.mrb[34].mxu0 %vm494_vm0, %v88_v57  ;;  %1652 = vmatmul.mubr.msk.f32.gmra.mrb[34].mxu1 %vm494_vm0, %v88_v57 }
 0x2c6   :  { %1239 = vmatprep.mubr.f32.mxu0 %v1831_v31  ;;  %1352 = vmatprep.mubr.f32.mxu1 %v1831_v31 }
 0x2c9   :  { %1645 = vmatmul.mubr.msk.f32.gmra.mrb[36].mxu0 %vm494_vm0, %v89_v43  ;;  %1653 = vmatmul.mubr.msk.f32.gmra.mrb[36].mxu1 %vm494_vm0, %v89_v43 }
 0x2ca   :  { %1245 = vmatprep.mubr.f32.mxu0 %v1831_v31  ;;  %1358 = vmatprep.mubr.f32.mxu1 %v1831_v31 }
 0x2cd   :  { %1646 = vmatmul.mubr.msk.f32.gmra.mrb[38].mxu0 %vm494_vm0, %v90_v28  ;;  %1654 = vmatmul.mubr.msk.f32.gmra.mrb[38].mxu1 %vm494_vm0, %v90_v28 }
 0x2ce   :  { %1251 = vmatprep.mubr.f32.mxu0 %v1831_v31  ;;  %1364 = vmatprep.mubr.f32.mxu1 %v1831_v31 }
 0x2d1   :  { %1647 = vmatmul.mubr.msk.f32.gmra.mrb[40].mxu0 %vm494_vm0, %v91_v44  ;;  %1655 = vmatmul.mubr.msk.f32.gmra.mrb[40].mxu1 %vm494_vm0, %v91_v44  ;;  %v1122_v44 = vpop.permute.xlu0 %1121 }
 0x2d2   :  { %1257 = vmatprep.mubr.f32.mxu0 %v1831_v31  ;;  %1370 = vmatprep.mubr.f32.mxu1 %v1831_v31 }
 0x2d5   :  { %1648 = vmatmul.mubr.msk.f32.gmra.mrb[42].mxu0 %vm494_vm0, %v92_v47  ;;  %1656 = vmatmul.mubr.msk.f32.gmra.mrb[42].mxu1 %vm494_vm0, %v92_v47 }
 0x2d6   :  { %1263 = vmatprep.mubr.f32.mxu0 %v1831_v31  ;;  %1376 = vmatprep.mubr.f32.mxu1 %v1831_v31 }
 0x2d9   :  { %1649 = vmatmul.mubr.msk.f32.gmra.mrb[44].mxu0 %vm494_vm0, %v93_v50  ;;  %1657 = vmatmul.mubr.msk.f32.gmra.mrb[44].mxu1 %vm494_vm0, %v93_v50 }
 0x2da   :  { %1269 = vmatprep.mubr.f32.mxu0 %v1831_v31  ;;  %1382 = vmatprep.mubr.f32.mxu1 %v1831_v31 }
 0x2dd   :  { %1650 = vmatmul.mubr.msk.f32.gmra.mrb[46].mxu0 %vm494_vm0, %v94_v51  ;;  %1658 = vmatmul.mubr.msk.f32.gmra.mrb[46].mxu1 %vm494_vm0, %v94_v51 }
 0x2de   :  { %1493 = vmatprep.mubr.f32.mxu0 %v1831_v31  ;;  %1564 = vmatprep.mubr.f32.mxu1 %v1831_v31 }
 0x394   :  { %v1229_v52 = vpop.f32.mrb[32].mxu0  ;;  %v1342_v48 = vpop.f32.mrb[32].mxu1 }
 0x395   :  { %v1231_v60 = vpop.f32.mrb[33].mxu0  ;;  %v1344_v62 = vpop.f32.mrb[33].mxu1  ;;  %v1230_v45 = vadd.f32 %v1229_v52, %v1102_v61  ;;  %v1343_v55 = vadd.f32 %v1342_v48, %v1102_v61 }
 0x396   :  { %v1232_v54 = vadd.f32 %v1231_v60, %v1102_v61  ;;  %v1345_v63 = vadd.f32 %v1344_v62, %v1102_v61  ;;  %v1127_v60 = vpop.permute.xlu1 %1126 }
 0x397   :  { %v1389_v14 = vmax.f32 %v1230_v45, 0.0  ;;  %v1405_v15 = vmax.f32 %v1343_v55, 0.0 }
 0x398   :  { %v1235_v56 = vpop.f32.mrb[34].mxu0  ;;  %v1348_v1 = vpop.f32.mrb[34].mxu1  ;;  %v1390_v17 = vmax.f32 %v1232_v54, 0.0  ;;  %v1406_v9 = vmax.f32 %v1345_v63, 0.0 }
 0x399   :  { %v1236_v0 = vadd.f32 %v1235_v56, %v1107_v53  ;;  %v1237_v2 = vpop.f32.mrb[35].mxu0  ;;  %v1349_v12 = vadd.f32 %v1348_v1, %v1107_v53  ;;  %v1350_v13 = vpop.f32.mrb[35].mxu1 }
 0x39a   :  { %v1238_v58 = vadd.f32 %v1237_v2, %v1107_v53  ;;  %v1351_v31 = vadd.f32 %v1350_v13, %v1107_v53 }
 0x39b   :  { %v1391_v46 = vmax.f32 %v1236_v0, 0.0  ;;  %v1407_v8 = vmax.f32 %v1349_v12, 0.0 }
 0x39c   :  { %v1392_v4 = vmax.f32 %v1238_v58, 0.0  ;;  %v1241_v18 = vpop.f32.mrb[36].mxu0  ;;  %v1408_v20 = vmax.f32 %v1351_v31, 0.0  ;;  %v1354_v21 = vpop.f32.mrb[36].mxu1 }
 0x39d   :  { %v1761_v19 = vpack.c.bf16 %v1391_v46, %v1389_v14  ;;  %v1243_v22 = vpop.f32.mrb[37].mxu0  ;;  %v1777_v59 = vpack.c.bf16 %v1407_v8, %v1405_v15  ;;  %v1356_v24 = vpop.f32.mrb[37].mxu1  ;;  %v1242_v6 = vadd.f32 %v1241_v18, %v1112_v23  ;;  %v1355_v25 = vadd.f32 %v1354_v21, %v1112_v23 }
 0x39e   :  { %v1759_v10 = vpack.c.bf16 %v1392_v4, %v1390_v17  ;;  %v1775_v5 = vpack.c.bf16 %v1408_v20, %v1406_v9  ;;  %v1244_v7 = vadd.f32 %v1243_v22, %v1112_v23  ;;  %v1357_v3 = vadd.f32 %v1356_v24, %v1112_v23 }
 0x39f   :  { %v1393_v34 = vmax.f32 %v1242_v6, 0.0  ;;  %v1409_v37 = vmax.f32 %v1355_v25, 0.0 }
 0x3a0   :  { %v1247_v16 = vpop.f32.mrb[38].mxu0  ;;  %1760 = vmatprep.subr.bf16.mxu0 %v1759_v10  ;;  %v1360_v27 = vpop.f32.mrb[38].mxu1  ;;  %1776 = vmatprep.subr.bf16.mxu1 %v1775_v5  ;;  %v1394_v38 = vmax.f32 %v1244_v7, 0.0  ;;  %v1410_v41 = vmax.f32 %v1357_v3, 0.0 }
 0x3a1   :  { %v1248_v26 = vadd.f32 %v1247_v16, %v1117_v11  ;;  %v1249_v29 = vpop.f32.mrb[39].mxu0  ;;  %1762 = vmatpush1.bf16.msra.mxu0 %v1761_v19  ;;  %v1361_v30 = vadd.f32 %v1360_v27, %v1117_v11  ;;  %v1362_v33 = vpop.f32.mrb[39].mxu1  ;;  %1778 = vmatpush1.bf16.msra.mxu1 %v1777_v59 }
 0x3a2   :  { %v1250_v32 = vadd.f32 %v1249_v29, %v1117_v11  ;;  %v1363_v35 = vadd.f32 %v1362_v33, %v1117_v11  ;;  %v1132_v19 = vpop.permute.xlu0 %1131  ;;  %v1137_v10 = vpop.permute.xlu1 %1136 }
 0x3a3   :  { %v1395_v49 = vmax.f32 %v1248_v26, 0.0  ;;  %v1411_v39 = vmax.f32 %v1361_v30, 0.0 }
 0x3a4   :  { %v1396_v36 = vmax.f32 %v1250_v32, 0.0  ;;  %v1253_v40 = vpop.f32.mrb[40].mxu0  ;;  %v1412_v57 = vmax.f32 %v1363_v35, 0.0  ;;  %v1366_v43 = vpop.f32.mrb[40].mxu1 }
 0x3a5   :  { %v1765_v42 = vpack.c.bf16 %v1395_v49, %v1393_v34  ;;  %v1255_v28 = vpop.f32.mrb[41].mxu0  ;;  %v1781_v47 = vpack.c.bf16 %v1411_v39, %v1409_v37  ;;  %v1368_v51 = vpop.f32.mrb[41].mxu1  ;;  %v1254_v48 = vadd.f32 %v1253_v40, %v1122_v44  ;;  %v1367_v61 = vadd.f32 %v1366_v43, %v1122_v44 }
 0x3a6   :  { %v1763_v50 = vpack.c.bf16 %v1396_v36, %v1394_v38  ;;  %v1779_v52 = vpack.c.bf16 %v1412_v57, %v1410_v41  ;;  %v1256_v62 = vadd.f32 %v1255_v28, %v1122_v44  ;;  %v1369_v53 = vadd.f32 %v1368_v51, %v1122_v44  ;;  %v1424_v57 = vpop.permute.xlu0 %1423 }
 0x3a7   :  { %v1397_v2 = vmax.f32 %v1254_v48, 0.0  ;;  %v1413_v13 = vmax.f32 %v1367_v61, 0.0 }
 0x3a8   :  { %v1259_v45 = vpop.f32.mrb[42].mxu0  ;;  %1764 = vmatprep.subr.bf16.mxu0 %v1763_v50  ;;  %v1372_v54 = vpop.f32.mrb[42].mxu1  ;;  %1780 = vmatprep.subr.bf16.mxu1 %v1779_v52  ;;  %v1398_v14 = vmax.f32 %v1256_v62, 0.0  ;;  %v1414_v17 = vmax.f32 %v1369_v53, 0.0 }
 0x3a9   :  { %v1260_v55 = vadd.f32 %v1259_v45, %v1127_v60  ;;  %v1261_v56 = vpop.f32.mrb[43].mxu0  ;;  %1766 = vmatpush1.bf16.msra.mxu0 %v1765_v42  ;;  %v1373_v63 = vadd.f32 %v1372_v54, %v1127_v60  ;;  %v1374_v1 = vpop.f32.mrb[43].mxu1  ;;  %1782 = vmatpush1.bf16.msra.mxu1 %v1781_v47  ;;  %v103_v42 = vld [vmem:[%s2340_s9] sm:$0x3] }
 0x3aa   :  { %v1262_v0 = vadd.f32 %v1261_v56, %v1127_v60  ;;  %v1375_v58 = vadd.f32 %v1374_v1, %v1127_v60 }
 0x3ab   :  { %v1399_v12 = vmax.f32 %v1260_v55, 0.0  ;;  %v1415_v46 = vmax.f32 %v1373_v63, 0.0 }
 0x3ac   :  { %v1400_v31 = vmax.f32 %v1262_v0, 0.0  ;;  %v1265_v15 = vpop.f32.mrb[44].mxu0  ;;  %v1416_v4 = vmax.f32 %v1375_v58, 0.0  ;;  %v1378_v18 = vpop.f32.mrb[44].mxu1 }
 0x3ad   :  { %v1769_v8 = vpack.c.bf16 %v1399_v12, %v1397_v2  ;;  %v1267_v9 = vpop.f32.mrb[45].mxu0  ;;  %v1785_v20 = vpack.c.bf16 %v1415_v46, %v1413_v13  ;;  %v1380_v22 = vpop.f32.mrb[45].mxu1  ;;  %v1266_v59 = vadd.f32 %v1265_v15, %v1132_v19  ;;  %v1379_v24 = vadd.f32 %v1378_v18, %v1132_v19 }
 0x3ae   :  { %v1767_v21 = vpack.c.bf16 %v1400_v31, %v1398_v14  ;;  %v1783_v23 = vpack.c.bf16 %v1416_v4, %v1414_v17  ;;  %v1268_v5 = vadd.f32 %v1267_v9, %v1132_v19  ;;  %v1381_v11 = vadd.f32 %v1380_v22, %v1132_v19 }
 0x3af   :  { %v1401_v29 = vmax.f32 %v1266_v59, 0.0  ;;  %v1417_v33 = vmax.f32 %v1379_v24, 0.0 }
 0x3b0   :  { %v1271_v6 = vpop.f32.mrb[46].mxu0  ;;  %1768 = vmatprep.subr.bf16.mxu0 %v1767_v21  ;;  %v1384_v7 = vpop.f32.mrb[46].mxu1  ;;  %1784 = vmatprep.subr.bf16.mxu1 %v1783_v23  ;;  %v1402_v34 = vmax.f32 %v1268_v5, 0.0  ;;  %v1418_v37 = vmax.f32 %v1381_v11, 0.0 }
 0x3b1   :  { %v1272_v25 = vadd.f32 %v1271_v6, %v1137_v10  ;;  %v1273_v16 = vpop.f32.mrb[47].mxu0  ;;  %1770 = vmatpush1.bf16.msra.mxu0 %v1769_v8  ;;  %v1385_v3 = vadd.f32 %v1384_v7, %v1137_v10  ;;  %v1386_v27 = vpop.f32.mrb[47].mxu1  ;;  %1786 = vmatpush1.bf16.msra.mxu1 %v1785_v20 }
 0x3b2   :  { %v1274_v26 = vadd.f32 %v1273_v16, %v1137_v10  ;;  %v1387_v32 = vadd.f32 %v1386_v27, %v1137_v10 }
 0x3b3   :  { %v1403_v30 = vmax.f32 %v1272_v25, 0.0  ;;  %v1419_v49 = vmax.f32 %v1385_v3, 0.0 }
 0x3b4   :  { %v1404_v35 = vmax.f32 %v1274_v26, 0.0  ;;  %v1420_v39 = vmax.f32 %v1387_v32, 0.0 }
 0x3b5   :  { %v1773_v38 = vpack.c.bf16 %v1403_v30, %v1401_v29  ;;  %v1789_v36 = vpack.c.bf16 %v1419_v49, %v1417_v33 }
 0x3b6   :  { %v1771_v40 = vpack.c.bf16 %v1404_v35, %v1402_v34  ;;  %v1787_v41 = vpack.c.bf16 %v1420_v39, %v1418_v37 }
 0x3b8   :  { %1772 = vmatprep.subr.bf16.mxu0 %v1771_v40  ;;  %1788 = vmatprep.subr.bf16.mxu1 %v1787_v41 }
 0x3b9   :  { %1774 = vmatpush1.bf16.msra.mxu0 %v1773_v38  ;;  %1790 = vmatpush1.bf16.msra.mxu1 %v1789_v36 }
 0x3bc   :  { %1659 = vmatmul.mubr.msk.f32.vlgmr.msra.gmra.mrb[48].mxu0 %vm494_vm0, %v103_v42  ;;  %1660 = vmatmul.mubr.msk.f32.vlgmr.msra.gmra.mrb[48].mxu1 %vm494_vm0, %v103_v42 }
 0x48f   :  { %v1495_v43 = vpop.f32.mrb[48].mxu0  ;;  %v1566_v44 = vpop.f32.mrb[48].mxu1 }
 0x490   :  { %v1496_v28 = vadd.f32 %v1495_v43, %v1424_v57  ;;  %v1497_v47 = vpop.f32.mrb[49].mxu0  ;;  %v1567_v50 = vadd.f32 %v1566_v44, %v1424_v57  ;;  %v1568_v52 = vpop.f32.mrb[49].mxu1 }
 0x491   :  { %v1498_v51 = vadd.f32 %v1497_v47, %v1424_v57  ;;  %v1569_v48 = vadd.f32 %v1568_v52, %v1424_v57 }
 0x493   :  { %v1573_v60 = vcombine.low %v1496_v28, %v1498_v51  ;;  %v1585_v61 = vcombine.low %v1567_v50, %v1569_v48 }
 0x495   :  { %1661 = vst.sshfl [vmem:[#allocation2] sm:$0x33 pattern:$0x76325410] %v1573_v60 }
 0x496   :  { %1662 = vst.sshfl [vmem:[#allocation2 + $0x4] sm:$0x33 pattern:$0x76325410] %v1585_v61 }
 0x497   :  { %1600 = vsyncadd [#allocation3], 32  ;;  %s1832_s9 = smov [#allocation2]  }
 0x498   :  { %s1602_s15 = sshll.u32 %s1832_s9, 4  ;;  %s1603_s15 = int_to_ptr.vmem [resolvable:$true] %s1602_s15 }
 0x499   :  { %s1805_s16 = scalar_lea.vmem %s1603_s15, 96  ;;  %s1809_s6 = scalar_lea.vmem %s1603_s15, 128 }
 0x49a   :  { %p1806_p0 = scmp.ne.s32.totalorder %s1603_s15, %s1805_s16  ;;  %p1810_p1 = scmp.lt.s32.totalorder %s1603_s15, %s1603_s15 }
 0x49b   :  { %p1811_p2 = scmp.lt.s32.totalorder %s1809_s6, %s1805_s16 }
 0x49d   :  { %p1812_p3 = por %p1811_p2, %p1810_p1 }
 0x49f   :  { %p1813_p4 = pnand %p1812_p3, %p1806_p0 }
 0x4a1   :  { %1816 = shalt.err (!%p1813_p4)
}
 0x4a2   :  { %s1817_s18 = scalar_lea.hbm %s2342_s11, 96 }
 0x4a3   :  { %p1818_p5 = scmp.ne.s32.totalorder %s2342_s11, %s1817_s18  ;;  %p1821_p6 = scmp.lt.u32.totalorder %s1817_s18, %s2342_s11 }
 0x4a5   :  { %p1823_p7 = pnand %p1821_p6, %p1818_p5 }
 0x4a7   :  { %1826 = shalt.err (!%p1823_p7)
}
 0x4a8   :  { %1605 = dma.vmem_to_hbm [thread:$0]  %s1603_s15, 96, %s2342_s11, [#allocation3]  }
 0x4a9   :  { %1827 = dma.done.wait [#allocation3], 128  }
 0x4aa   :  { %1828 = vsyncadd [#allocation3], 4294967168 }
 0x4ab   :  { %1609 = vsyncpa [#allocation3], 1 }

</bundles_post_ra>
